<compile_context>
chip_gen: v7x
topology: tpu7x:2x2x1
jax: 0.10.0
libtpu: 0.0.40
codegen_flags: <defaults>
</compile_context>

<pallas_src>
import functools

import numpy as np
import jax
import jax.numpy as jnp
from jax.experimental import pallas as pl
from jax.experimental.pallas import tpu as pltpu


# ----------------------------------------------------------------------------
# In-kernel multi-head attention with the output projection folded in.
#   q/k/v: (Nq, C)/(Nk, C)/(Nk, C) bf16, wp: (C, C) bf16 -> (Nq, C) f32
# Heads are static lane slices; per-head results are accumulated directly into
# the projected output (no concat / relayout).
# ----------------------------------------------------------------------------
def _attn_proj(q_bf, k_bf, v_bf, wp_bf, num_heads, scale):
    C = q_bf.shape[-1]
    hd = C // num_heads
    out = None
    for h in range(num_heads):                    # small static unrolled loop
        lo, hi = h * hd, (h + 1) * hd
        # s = qh @ kh^T (contract head dim directly, no explicit transpose)
        s = jax.lax.dot_general(q_bf[:, lo:hi], k_bf[:, lo:hi],
                                (((1,), (1,)), ((), ())),
                                preferred_element_type=jnp.float32) * scale
        # softmax in f32 for stability; denominator on the EUP slot
        s = s - jnp.max(s, axis=-1, keepdims=True)
        p = jnp.exp(s)
        p = p * pl.reciprocal(jnp.sum(p, axis=-1, keepdims=True), approx=True)
        oh = jnp.dot(p.astype(jnp.bfloat16), v_bf[:, lo:hi],
                     preferred_element_type=jnp.float32)            # (Nq, hd)
        contrib = jnp.dot(oh.astype(jnp.bfloat16), wp_bf[lo:hi, :],
                          preferred_element_type=jnp.float32)       # (Nq, C)
        out = contrib if out is None else out + contrib
    return out


# ----------------------------------------------------------------------------
# Fused kernels (one block of `bt` batch elements per grid step).
# ----------------------------------------------------------------------------
def _fused_kernel_sr1(x_ref, wqkv_ref, wp_ref, bp_ref, o_ref, *,
                      num_heads, scale, bt, n):
    C = wp_ref.shape[0]
    x = x_ref[...].astype(jnp.bfloat16)                              # (bt*n, C)
    wp = wp_ref[...]
    bp = bp_ref[...]                                                 # (1, C) f32
    # fused q|k|v projection: one tall MXU matmul
    qkv = jnp.dot(x, wqkv_ref[...], preferred_element_type=jnp.float32)  # (bt*n, 3C)
    for b in range(bt):                                              # static loop
        lo = b * n
        blk = qkv[lo:lo + n, :]
        q_bf = blk[:, :C].astype(jnp.bfloat16)
        k_bf = blk[:, C:2 * C].astype(jnp.bfloat16)
        v_bf = blk[:, 2 * C:].astype(jnp.bfloat16)
        out_b = _attn_proj(q_bf, k_bf, v_bf, wp, num_heads, scale) + bp
        o_ref[lo:lo + n, :] = out_b.astype(o_ref.dtype)


def _fused_kernel_sr(x_ref, xw_ref, wsr_ref, wq_ref, wkv_ref, wp_ref, vec_ref,
                     o_ref, *, num_heads, scale, bt, n, wo):
    C = wp_ref.shape[0]
    b_sr = vec_ref[0:1, :]
    ln_g = vec_ref[1:2, :]
    ln_b = vec_ref[2:3, :]
    bp = vec_ref[3:4, :]
    wp = wp_ref[...]

    # q projection on the full-resolution tokens (tall matmul across the block)
    x = x_ref[...].astype(jnp.bfloat16)                              # (bt*n, C)
    q_all = jnp.dot(x, wq_ref[...], preferred_element_type=jnp.float32)

    # spatial reduction: Conv2d(C, C, k=(1,sr), stride=(1,sr)) as per-window linear
    xw = xw_ref[...].astype(jnp.bfloat16)                            # (bt*wo, sr*C)
    xr = jnp.dot(xw, wsr_ref[...], preferred_element_type=jnp.float32) + b_sr
    # LayerNorm over channels, eps = 1e-5 (PyTorch default), stats in f32
    mean = jnp.mean(xr, axis=-1, keepdims=True)
    var = jnp.mean((xr - mean) * (xr - mean), axis=-1, keepdims=True)
    xr = (xr - mean) * jax.lax.rsqrt(var + 1e-5) * ln_g + ln_b

    kv_all = jnp.dot(xr.astype(jnp.bfloat16), wkv_ref[...],
                     preferred_element_type=jnp.float32)             # (bt*wo, 2C)

    for b in range(bt):                                              # static loop
        qlo, klo = b * n, b * wo
        q_bf = q_all[qlo:qlo + n, :].astype(jnp.bfloat16)
        kv_b = kv_all[klo:klo + wo, :]
        k_bf = kv_b[:, :C].astype(jnp.bfloat16)
        v_bf = kv_b[:, C:].astype(jnp.bfloat16)
        out_b = _attn_proj(q_bf, k_bf, v_bf, wp, num_heads, scale) + bp
        o_ref[qlo:qlo + n, :] = out_b.astype(o_ref.dtype)


# ----------------------------------------------------------------------------
# Batch-block size: amortize per-grid-step overhead, keep >= 2 parallel steps
# (v7x dual TensorCore), keep per-step activation footprint small.
# ----------------------------------------------------------------------------
def _pick_bt(B, N, C):
    cap = max(1, (4 << 20) // (16 * N * C))        # ~4 MiB of f32 activation slabs
    best = 1
    for bt in range(1, B + 1):
        if B % bt != 0 or bt > cap:
            continue
        if B >= 2 and B // bt < 2:                 # keep >= 2 parallel grid steps
            continue
        best = max(best, bt)
    return best


# ----------------------------------------------------------------------------
# Forward wrapper (weight prep in plain JAX, one fused pallas_call).
# ----------------------------------------------------------------------------
def attention_withpyramid(x, params, num_heads, sr_ratio, bt=None):
    B, N, C = x.shape
    assert C % num_heads == 0
    hd = C // num_heads
    scale = hd ** -0.5
    dtype = x.dtype

    if bt is None:
        bt = _pick_bt(B, N, C)
    assert B % bt == 0
    gb = B // bt

    # Pre-transpose weights once (x @ W^T form) and cast to bf16 MXU operands.
    wq_t = jnp.asarray(params["wq"]).T.astype(jnp.bfloat16)       # (C, C)
    wkv_t = jnp.asarray(params["wkv"]).T.astype(jnp.bfloat16)     # (C, 2C)
    wp_t = jnp.asarray(params["wp"]).T.astype(jnp.bfloat16)       # (C, C)
    bp = jnp.asarray(params["bp"]).reshape(1, C).astype(jnp.float32)

    # Batched activation view: (gb, bt*N, C) is a free contiguous reshape.
    xg = x.reshape(gb, bt * N, C)

    wspec = lambda shape: pl.BlockSpec(shape, lambda g: (0, 0))
    xspec = pl.BlockSpec((None, bt * N, C), lambda g: (g, 0, 0))
    ospec = pl.BlockSpec((None, bt * N, C), lambda g: (g, 0, 0))
    cparams = pltpu.CompilerParams(
        dimension_semantics=("parallel",),
        vmem_limit_bytes=32 * 1024 * 1024)

    if sr_ratio > 1:
        H_, W_ = 1, 200 // sr_ratio          # hard-coded exactly like the module
        assert N == H_ * W_, "module's forward requires N == 200 // sr_ratio"
        Wo = W_ // sr_ratio
        # window-concat view: xw[g, b*Wo+wo, k*C+c] == x[g*bt+b, wo*sr+k, c] (free reshape)
        xw = x.reshape(gb, bt * Wo, sr_ratio * C)
        # conv weight (co, ci, 1, k) -> ((k, ci), co), matching xw's (k, c) layout
        w_sr_t = jnp.transpose(jnp.asarray(params["w_sr"])[:, :, 0, :],
                               (2, 1, 0)).reshape(sr_ratio * C, C).astype(jnp.bfloat16)
        # pack the four (C,) vectors into one (4, C) input (fewer DMA streams)
        vecs = jnp.stack([jnp.asarray(params["b_sr"]),
                          jnp.asarray(params["ln_w"]),
                          jnp.asarray(params["ln_b"]),
                          jnp.asarray(params["bp"])], axis=0).astype(jnp.float32)

        kern = functools.partial(_fused_kernel_sr, num_heads=num_heads,
                                 scale=scale, bt=bt, n=N, wo=Wo)
        out = pl.pallas_call(
            kern,
            out_shape=jax.ShapeDtypeStruct((gb, bt * N, C), dtype),
            grid=(gb,),
            in_specs=[
                xspec,                                                      # x
                pl.BlockSpec((None, bt * Wo, sr_ratio * C),
                             lambda g: (g, 0, 0)),                          # xw
                wspec((sr_ratio * C, C)),                                   # w_sr^T
                wspec((C, C)),                                              # wq^T
                wspec((C, 2 * C)),                                          # wkv^T
                wspec((C, C)),                                              # wp^T
                wspec((4, C)),                                              # packed vecs
            ],
            out_specs=ospec,
            compiler_params=cparams,
        )(xg, xw, w_sr_t, wq_t, wkv_t, wp_t, vecs)
    else:
        # fused [q | k | v] projection weight
        wqkv_t = jnp.concatenate([wq_t, wkv_t], axis=1)                     # (C, 3C)
        kern = functools.partial(_fused_kernel_sr1, num_heads=num_heads,
                                 scale=scale, bt=bt, n=N)
        out = pl.pallas_call(
            kern,
            out_shape=jax.ShapeDtypeStruct((gb, bt * N, C), dtype),
            grid=(gb,),
            in_specs=[
                xspec,                   # x
                wspec((C, 3 * C)),       # [wq | wkv]^T
                wspec((C, C)),           # wp^T
                wspec((1, C)),           # bp
            ],
            out_specs=ospec,
            compiler_params=cparams,
        )(xg, wqkv_t, wp_t, bp)

    return out.reshape(B, N, C)


# ----------------------------------------------------------------------------
# Pure-JAX reference (mirrors the PyTorch forward) for correctness check
# ----------------------------------------------------------------------------
def reference(x, params, num_heads, sr_ratio):
    hi = jax.lax.Precision.HIGHEST
    B, N, C = x.shape
    hd = C // num_heads
    scale = hd ** -0.5
    q = jnp.einsum("bnc,oc->bno", x, params["wq"], precision=hi)
    q = q.reshape(B, N, num_heads, hd).transpose(0, 2, 1, 3)
    if sr_ratio > 1:
        H_, W_ = 1, 200 // sr_ratio
        x_ = x.transpose(0, 2, 1).reshape(B, C, H_, W_)
        xw = x_.reshape(B, C, W_ // sr_ratio, sr_ratio)
        conv = jnp.einsum("bcwk,ock->bow", xw, params["w_sr"][:, :, 0, :],
                          precision=hi) + params["b_sr"][None, :, None]
        x_ = conv.reshape(B, C, -1).transpose(0, 2, 1)
        mean = jnp.mean(x_, axis=-1, keepdims=True)
        var = jnp.mean((x_ - mean) ** 2, axis=-1, keepdims=True)
        x_ = (x_ - mean) / jnp.sqrt(var + 1e-5) * params["ln_w"] + params["ln_b"]
    else:
        x_ = x
    kv = jnp.einsum("bnc,oc->bno", x_, params["wkv"], precision=hi)
    kv = kv.reshape(B, -1, 2, num_heads, hd).transpose(2, 0, 3, 1, 4)
    k, v = kv[0], kv[1]
    attn = jnp.einsum("bhqd,bhkd->bhqk", q, k, precision=hi) * scale
    attn = jax.nn.softmax(attn, axis=-1)
    o = jnp.einsum("bhqk,bhkd->bhqd", attn, v, precision=hi)
    o = o.transpose(0, 2, 1, 3).reshape(B, N, C)
    return jnp.einsum("bnc,oc->bno", o, params["wp"], precision=hi) + params["bp"]


# ----------------------------------------------------------------------------
def make_params(key, dim, sr_ratio):
    ks = jax.random.split(key, 8)
    p = {
        "wq": jax.random.normal(ks[0], (dim, dim), jnp.float32) * 0.1,       # q.weight (no bias)
        "wkv": jax.random.normal(ks[1], (2 * dim, dim), jnp.float32) * 0.1,  # kv.weight (no bias)
        "wp": jax.random.normal(ks[2], (dim, dim), jnp.float32) * 0.1,       # proj.weight
        "bp": jax.random.normal(ks[3], (dim,), jnp.float32) * 0.1,           # proj.bias
    }
    if sr_ratio > 1:
        p["w_sr"] = jax.random.normal(ks[4], (dim, dim, 1, sr_ratio), jnp.float32) * 0.1
        p["b_sr"] = jax.random.normal(ks[5], (dim,), jnp.float32) * 0.1
        p["ln_w"] = 1.0 + 0.1 * jax.random.normal(ks[6], (dim,), jnp.float32)
        p["ln_b"] = 0.1 * jax.random.normal(ks[7], (dim,), jnp.float32)
    return p


if __name__ == "__main__":
    dim, num_heads = 32, 4
    key = jax.random.PRNGKey(0)

    # (sr_ratio, N, B): sr_ratio > 1 requires N == 200 // sr_ratio (hard-coded in forward).
    cases = [(1, 8, 8), (2, 100, 4)]
    for idx, (sr_ratio, N, B) in enumerate(cases):
        kx, kp = jax.random.split(jax.random.fold_in(key, idx))
        x = jax.random.normal(kx, (B, N, dim), jnp.float32)
        params = make_params(kp, dim, sr_ratio)

        out = attention_withpyramid(x, params, num_heads, sr_ratio)
        out = jax.block_until_ready(out)

        ref = reference(x, params, num_heads, sr_ratio)
        # bf16 MXU operands with f32 accumulation vs. a HIGHEST-precision reference
        np.testing.assert_allclose(np.asarray(out), np.asarray(ref),
                                   rtol=2e-2, atol=2e-2)

    print("KERNEL_OK")
</pallas_src>

<mosaic_0001>
module attributes {stable_mosaic.version = 11 : i64} {
  func.func @_fused_kernel_sr1(%arg0: i32, %arg1: memref<1x32x32xf32, #tpu.memory_space<vmem>>, %arg2: memref<32x96xbf16, #tpu.memory_space<vmem>>, %arg3: memref<32x32xbf16, #tpu.memory_space<vmem>>, %arg4: memref<1x32xf32, #tpu.memory_space<vmem>>, %arg5: memref<1x32x32xf32, #tpu.memory_space<vmem>>) attributes {dimension_semantics = [#tpu.dimension_semantics<parallel>], iteration_bounds = array<i64: 2>, scalar_prefetch = 0 : i64, scratch_operands = 0 : i64, tpu.core_type = #tpu.core_type<tc>, window_params = [{transform_indices = @transform_0, window_bounds = array<i64: 1, 32, 32>}, {pipeline_mode = #tpu.pipeline_mode<synchronous>, transform_indices = @transform_1, window_bounds = array<i64: 32, 96>}, {pipeline_mode = #tpu.pipeline_mode<synchronous>, transform_indices = @transform_2, window_bounds = array<i64: 32, 32>}, {pipeline_mode = #tpu.pipeline_mode<synchronous>, transform_indices = @transform_3, window_bounds = array<i64: 1, 32>}, {transform_indices = @transform_4, window_bounds = array<i64: 1, 32, 32>}]} {
    %c0 = arith.constant 0 : index
    %c0_0 = arith.constant 0 : index
    %c0_1 = arith.constant 0 : index
    %0 = vector.load %arg1[%c0, %c0_0, %c0_1] : memref<1x32x32xf32, #tpu.memory_space<vmem>>, vector<1x32x32xf32>
    %1 = vector.shape_cast %0 : vector<1x32x32xf32> to vector<32x32xf32>
    %2 = arith.truncf %1 : vector<32x32xf32> to vector<32x32xbf16>
    %c0_2 = arith.constant 0 : index
    %c0_3 = arith.constant 0 : index
    %3 = vector.load %arg3[%c0_2, %c0_3] : memref<32x32xbf16, #tpu.memory_space<vmem>>, vector<32x32xbf16>
    %c0_4 = arith.constant 0 : index
    %c0_5 = arith.constant 0 : index
    %4 = vector.load %arg4[%c0_4, %c0_5] : memref<1x32xf32, #tpu.memory_space<vmem>>, vector<1x32xf32>
    %c0_6 = arith.constant 0 : index
    %c0_7 = arith.constant 0 : index
    %5 = vector.load %arg2[%c0_6, %c0_7] : memref<32x96xbf16, #tpu.memory_space<vmem>>, vector<32x96xbf16>
    %cst = arith.constant dense<0.000000e+00> : vector<32x96xf32>
    %6 = tpu.matmul %2, %5, %cst {dimension_numbers = #tpu.dot_dimension_numbers<[1], [0], [0], [1], [0, 0, 1, 1], [], []>} : vector<32x32xbf16>, vector<32x96xbf16>, vector<32x96xf32> -> vector<32x96xf32>
    %7 = vector.extract_strided_slice %6 {offsets = [0, 0], sizes = [8, 96], strides = [1, 1]} : vector<32x96xf32> to vector<8x96xf32>
    %8 = vector.extract_strided_slice %7 {offsets = [0, 0], sizes = [8, 32], strides = [1, 1]} : vector<8x96xf32> to vector<8x32xf32>
    %9 = arith.truncf %8 : vector<8x32xf32> to vector<8x32xbf16>
    %10 = vector.extract_strided_slice %7 {offsets = [0, 32], sizes = [8, 32], strides = [1, 1]} : vector<8x96xf32> to vector<8x32xf32>
    %11 = arith.truncf %10 : vector<8x32xf32> to vector<8x32xbf16>
    %12 = vector.extract_strided_slice %7 {offsets = [0, 64], sizes = [8, 32], strides = [1, 1]} : vector<8x96xf32> to vector<8x32xf32>
    %13 = arith.truncf %12 : vector<8x32xf32> to vector<8x32xbf16>
    %14 = vector.extract_strided_slice %9 {offsets = [0, 0], sizes = [8, 8], strides = [1, 1]} : vector<8x32xbf16> to vector<8x8xbf16>
    %15 = vector.extract_strided_slice %11 {offsets = [0, 0], sizes = [8, 8], strides = [1, 1]} : vector<8x32xbf16> to vector<8x8xbf16>
    %cst_8 = arith.constant dense<0.000000e+00> : vector<8x8xf32>
    %16 = tpu.matmul %14, %15, %cst_8 {dimension_numbers = #tpu.dot_dimension_numbers<[1], [1], [0], [0], [0, 0, 1, 0], [], []>} : vector<8x8xbf16>, vector<8x8xbf16>, vector<8x8xf32> -> vector<8x8xf32>
    %cst_9 = arith.constant 0.353553385 : f32
    %17 = vector.broadcast %cst_9 : f32 to vector<8x8xf32>
    %18 = arith.mulf %16, %17 : vector<8x8xf32>
    %cst_10 = arith.constant dense<0xFF800000> : vector<8xf32>
    %19 = vector.multi_reduction <maximumf>, %18, %cst_10 [1] : vector<8x8xf32> to vector<8xf32>
    %20 = vector.shape_cast %19 : vector<8xf32> to vector<8x1xf32>
    %21 = vector.broadcast %20 : vector<8x1xf32> to vector<8x8xf32>
    %22 = arith.subf %18, %21 : vector<8x8xf32>
    %23 = math.exp %22 : vector<8x8xf32>
    %cst_11 = arith.constant dense<0.000000e+00> : vector<8xf32>
    %24 = vector.multi_reduction <add>, %23, %cst_11 [1] : vector<8x8xf32> to vector<8xf32>
    %25 = vector.shape_cast %24 : vector<8xf32> to vector<8x1xf32>
    %26 = tpu.reciprocal %25 {approx = true} : vector<8x1xf32> -> vector<8x1xf32>
    %27 = vector.broadcast %26 : vector<8x1xf32> to vector<8x8xf32>
    %28 = arith.mulf %23, %27 : vector<8x8xf32>
    %29 = arith.truncf %28 : vector<8x8xf32> to vector<8x8xbf16>
    %30 = vector.extract_strided_slice %13 {offsets = [0, 0], sizes = [8, 8], strides = [1, 1]} : vector<8x32xbf16> to vector<8x8xbf16>
    %cst_12 = arith.constant dense<0.000000e+00> : vector<8x8xf32>
    %31 = tpu.matmul %29, %30, %cst_12 {dimension_numbers = #tpu.dot_dimension_numbers<[1], [0], [0], [1], [0, 0, 1, 1], [], []>} : vector<8x8xbf16>, vector<8x8xbf16>, vector<8x8xf32> -> vector<8x8xf32>
    %32 = arith.truncf %31 : vector<8x8xf32> to vector<8x8xbf16>
    %33 = vector.extract_strided_slice %3 {offsets = [0, 0], sizes = [8, 32], strides = [1, 1]} : vector<32x32xbf16> to vector<8x32xbf16>
    %cst_13 = arith.constant dense<0.000000e+00> : vector<8x32xf32>
    %34 = tpu.matmul %32, %33, %cst_13 {dimension_numbers = #tpu.dot_dimension_numbers<[1], [0], [0], [1], [0, 0, 1, 1], [], []>} : vector<8x8xbf16>, vector<8x32xbf16>, vector<8x32xf32> -> vector<8x32xf32>
    %35 = vector.extract_strided_slice %9 {offsets = [0, 8], sizes = [8, 8], strides = [1, 1]} : vector<8x32xbf16> to vector<8x8xbf16>
    %36 = vector.extract_strided_slice %11 {offsets = [0, 8], sizes = [8, 8], strides = [1, 1]} : vector<8x32xbf16> to vector<8x8xbf16>
    %cst_14 = arith.constant dense<0.000000e+00> : vector<8x8xf32>
    %37 = tpu.matmul %35, %36, %cst_14 {dimension_numbers = #tpu.dot_dimension_numbers<[1], [1], [0], [0], [0, 0, 1, 0], [], []>} : vector<8x8xbf16>, vector<8x8xbf16>, vector<8x8xf32> -> vector<8x8xf32>
    %cst_15 = arith.constant 0.353553385 : f32
    %38 = vector.broadcast %cst_15 : f32 to vector<8x8xf32>
    %39 = arith.mulf %37, %38 : vector<8x8xf32>
    %cst_16 = arith.constant dense<0xFF800000> : vector<8xf32>
    %40 = vector.multi_reduction <maximumf>, %39, %cst_16 [1] : vector<8x8xf32> to vector<8xf32>
    %41 = vector.shape_cast %40 : vector<8xf32> to vector<8x1xf32>
    %42 = vector.broadcast %41 : vector<8x1xf32> to vector<8x8xf32>
    %43 = arith.subf %39, %42 : vector<8x8xf32>
    %44 = math.exp %43 : vector<8x8xf32>
    %cst_17 = arith.constant dense<0.000000e+00> : vector<8xf32>
    %45 = vector.multi_reduction <add>, %44, %cst_17 [1] : vector<8x8xf32> to vector<8xf32>
    %46 = vector.shape_cast %45 : vector<8xf32> to vector<8x1xf32>
    %47 = tpu.reciprocal %46 {approx = true} : vector<8x1xf32> -> vector<8x1xf32>
    %48 = vector.broadcast %47 : vector<8x1xf32> to vector<8x8xf32>
    %49 = arith.mulf %44, %48 : vector<8x8xf32>
    %50 = arith.truncf %49 : vector<8x8xf32> to vector<8x8xbf16>
    %51 = vector.extract_strided_slice %13 {offsets = [0, 8], sizes = [8, 8], strides = [1, 1]} : vector<8x32xbf16> to vector<8x8xbf16>
    %cst_18 = arith.constant dense<0.000000e+00> : vector<8x8xf32>
    %52 = tpu.matmul %50, %51, %cst_18 {dimension_numbers = #tpu.dot_dimension_numbers<[1], [0], [0], [1], [0, 0, 1, 1], [], []>} : vector<8x8xbf16>, vector<8x8xbf16>, vector<8x8xf32> -> vector<8x8xf32>
    %53 = arith.truncf %52 : vector<8x8xf32> to vector<8x8xbf16>
    %54 = vector.extract_strided_slice %3 {offsets = [8, 0], sizes = [8, 32], strides = [1, 1]} : vector<32x32xbf16> to vector<8x32xbf16>
    %cst_19 = arith.constant dense<0.000000e+00> : vector<8x32xf32>
    %55 = tpu.matmul %53, %54, %cst_19 {dimension_numbers = #tpu.dot_dimension_numbers<[1], [0], [0], [1], [0, 0, 1, 1], [], []>} : vector<8x8xbf16>, vector<8x32xbf16>, vector<8x32xf32> -> vector<8x32xf32>
    %56 = arith.addf %34, %55 : vector<8x32xf32>
    %57 = vector.extract_strided_slice %9 {offsets = [0, 16], sizes = [8, 8], strides = [1, 1]} : vector<8x32xbf16> to vector<8x8xbf16>
    %58 = vector.extract_strided_slice %11 {offsets = [0, 16], sizes = [8, 8], strides = [1, 1]} : vector<8x32xbf16> to vector<8x8xbf16>
    %cst_20 = arith.constant dense<0.000000e+00> : vector<8x8xf32>
    %59 = tpu.matmul %57, %58, %cst_20 {dimension_numbers = #tpu.dot_dimension_numbers<[1], [1], [0], [0], [0, 0, 1, 0], [], []>} : vector<8x8xbf16>, vector<8x8xbf16>, vector<8x8xf32> -> vector<8x8xf32>
    %cst_21 = arith.constant 0.353553385 : f32
    %60 = vector.broadcast %cst_21 : f32 to vector<8x8xf32>
    %61 = arith.mulf %59, %60 : vector<8x8xf32>
    %cst_22 = arith.constant dense<0xFF800000> : vector<8xf32>
    %62 = vector.multi_reduction <maximumf>, %61, %cst_22 [1] : vector<8x8xf32> to vector<8xf32>
    %63 = vector.shape_cast %62 : vector<8xf32> to vector<8x1xf32>
    %64 = vector.broadcast %63 : vector<8x1xf32> to vector<8x8xf32>
    %65 = arith.subf %61, %64 : vector<8x8xf32>
    %66 = math.exp %65 : vector<8x8xf32>
    %cst_23 = arith.constant dense<0.000000e+00> : vector<8xf32>
    %67 = vector.multi_reduction <add>, %66, %cst_23 [1] : vector<8x8xf32> to vector<8xf32>
    %68 = vector.shape_cast %67 : vector<8xf32> to vector<8x1xf32>
    %69 = tpu.reciprocal %68 {approx = true} : vector<8x1xf32> -> vector<8x1xf32>
    %70 = vector.broadcast %69 : vector<8x1xf32> to vector<8x8xf32>
    %71 = arith.mulf %66, %70 : vector<8x8xf32>
    %72 = arith.truncf %71 : vector<8x8xf32> to vector<8x8xbf16>
    %73 = vector.extract_strided_slice %13 {offsets = [0, 16], sizes = [8, 8], strides = [1, 1]} : vector<8x32xbf16> to vector<8x8xbf16>
    %cst_24 = arith.constant dense<0.000000e+00> : vector<8x8xf32>
    %74 = tpu.matmul %72, %73, %cst_24 {dimension_numbers = #tpu.dot_dimension_numbers<[1], [0], [0], [1], [0, 0, 1, 1], [], []>} : vector<8x8xbf16>, vector<8x8xbf16>, vector<8x8xf32> -> vector<8x8xf32>
    %75 = arith.truncf %74 : vector<8x8xf32> to vector<8x8xbf16>
    %76 = vector.extract_strided_slice %3 {offsets = [16, 0], sizes = [8, 32], strides = [1, 1]} : vector<32x32xbf16> to vector<8x32xbf16>
    %cst_25 = arith.constant dense<0.000000e+00> : vector<8x32xf32>
    %77 = tpu.matmul %75, %76, %cst_25 {dimension_numbers = #tpu.dot_dimension_numbers<[1], [0], [0], [1], [0, 0, 1, 1], [], []>} : vector<8x8xbf16>, vector<8x32xbf16>, vector<8x32xf32> -> vector<8x32xf32>
    %78 = arith.addf %56, %77 : vector<8x32xf32>
    %79 = vector.extract_strided_slice %9 {offsets = [0, 24], sizes = [8, 8], strides = [1, 1]} : vector<8x32xbf16> to vector<8x8xbf16>
    %80 = vector.extract_strided_slice %11 {offsets = [0, 24], sizes = [8, 8], strides = [1, 1]} : vector<8x32xbf16> to vector<8x8xbf16>
    %cst_26 = arith.constant dense<0.000000e+00> : vector<8x8xf32>
    %81 = tpu.matmul %79, %80, %cst_26 {dimension_numbers = #tpu.dot_dimension_numbers<[1], [1], [0], [0], [0, 0, 1, 0], [], []>} : vector<8x8xbf16>, vector<8x8xbf16>, vector<8x8xf32> -> vector<8x8xf32>
    %cst_27 = arith.constant 0.353553385 : f32
    %82 = vector.broadcast %cst_27 : f32 to vector<8x8xf32>
    %83 = arith.mulf %81, %82 : vector<8x8xf32>
    %cst_28 = arith.constant dense<0xFF800000> : vector<8xf32>
    %84 = vector.multi_reduction <maximumf>, %83, %cst_28 [1] : vector<8x8xf32> to vector<8xf32>
    %85 = vector.shape_cast %84 : vector<8xf32> to vector<8x1xf32>
    %86 = vector.broadcast %85 : vector<8x1xf32> to vector<8x8xf32>
    %87 = arith.subf %83, %86 : vector<8x8xf32>
    %88 = math.exp %87 : vector<8x8xf32>
    %cst_29 = arith.constant dense<0.000000e+00> : vector<8xf32>
    %89 = vector.multi_reduction <add>, %88, %cst_29 [1] : vector<8x8xf32> to vector<8xf32>
    %90 = vector.shape_cast %89 : vector<8xf32> to vector<8x1xf32>
    %91 = tpu.reciprocal %90 {approx = true} : vector<8x1xf32> -> vector<8x1xf32>
    %92 = vector.broadcast %91 : vector<8x1xf32> to vector<8x8xf32>
    %93 = arith.mulf %88, %92 : vector<8x8xf32>
    %94 = arith.truncf %93 : vector<8x8xf32> to vector<8x8xbf16>
    %95 = vector.extract_strided_slice %13 {offsets = [0, 24], sizes = [8, 8], strides = [1, 1]} : vector<8x32xbf16> to vector<8x8xbf16>
    %cst_30 = arith.constant dense<0.000000e+00> : vector<8x8xf32>
    %96 = tpu.matmul %94, %95, %cst_30 {dimension_numbers = #tpu.dot_dimension_numbers<[1], [0], [0], [1], [0, 0, 1, 1], [], []>} : vector<8x8xbf16>, vector<8x8xbf16>, vector<8x8xf32> -> vector<8x8xf32>
    %97 = arith.truncf %96 : vector<8x8xf32> to vector<8x8xbf16>
    %98 = vector.extract_strided_slice %3 {offsets = [24, 0], sizes = [8, 32], strides = [1, 1]} : vector<32x32xbf16> to vector<8x32xbf16>
    %cst_31 = arith.constant dense<0.000000e+00> : vector<8x32xf32>
    %99 = tpu.matmul %97, %98, %cst_31 {dimension_numbers = #tpu.dot_dimension_numbers<[1], [0], [0], [1], [0, 0, 1, 1], [], []>} : vector<8x8xbf16>, vector<8x32xbf16>, vector<8x32xf32> -> vector<8x32xf32>
    %100 = arith.addf %78, %99 : vector<8x32xf32>
    %101 = vector.broadcast %4 : vector<1x32xf32> to vector<8x32xf32>
    %102 = arith.addf %100, %101 : vector<8x32xf32>
    %c0_32 = arith.constant 0 : index
    %c0_33 = arith.constant 0 : index
    %c0_34 = arith.constant 0 : index
    %103 = vector.load %arg5[%c0_32, %c0_33, %c0_34] : memref<1x32x32xf32, #tpu.memory_space<vmem>>, vector<1x8x32xf32>
    %104 = vector.shape_cast %103 : vector<1x8x32xf32> to vector<8x32xf32>
    %105 = vector.shape_cast %102 : vector<8x32xf32> to vector<1x8x32xf32>
    tpu.vector_store %arg5[%c0_32, %c0_33, %c0_34], %105 {strides = array<i32>} : memref<1x32x32xf32, #tpu.memory_space<vmem>>, vector<1x8x32xf32>,
    %106 = vector.extract_strided_slice %6 {offsets = [8, 0], sizes = [8, 96], strides = [1, 1]} : vector<32x96xf32> to vector<8x96xf32>
    %107 = vector.extract_strided_slice %106 {offsets = [0, 0], sizes = [8, 32], strides = [1, 1]} : vector<8x96xf32> to vector<8x32xf32>
    %108 = arith.truncf %107 : vector<8x32xf32> to vector<8x32xbf16>
    %109 = vector.extract_strided_slice %106 {offsets = [0, 32], sizes = [8, 32], strides = [1, 1]} : vector<8x96xf32> to vector<8x32xf32>
    %110 = arith.truncf %109 : vector<8x32xf32> to vector<8x32xbf16>
    %111 = vector.extract_strided_slice %106 {offsets = [0, 64], sizes = [8, 32], strides = [1, 1]} : vector<8x96xf32> to vector<8x32xf32>
    %112 = arith.truncf %111 : vector<8x32xf32> to vector<8x32xbf16>
    %113 = vector.extract_strided_slice %108 {offsets = [0, 0], sizes = [8, 8], strides = [1, 1]} : vector<8x32xbf16> to vector<8x8xbf16>
    %114 = vector.extract_strided_slice %110 {offsets = [0, 0], sizes = [8, 8], strides = [1, 1]} : vector<8x32xbf16> to vector<8x8xbf16>
    %cst_35 = arith.constant dense<0.000000e+00> : vector<8x8xf32>
    %115 = tpu.matmul %113, %114, %cst_35 {dimension_numbers = #tpu.dot_dimension_numbers<[1], [1], [0], [0], [0, 0, 1, 0], [], []>} : vector<8x8xbf16>, vector<8x8xbf16>, vector<8x8xf32> -> vector<8x8xf32>
    %cst_36 = arith.constant 0.353553385 : f32
    %116 = vector.broadcast %cst_36 : f32 to vector<8x8xf32>
    %117 = arith.mulf %115, %116 : vector<8x8xf32>
    %cst_37 = arith.constant dense<0xFF800000> : vector<8xf32>
    %118 = vector.multi_reduction <maximumf>, %117, %cst_37 [1] : vector<8x8xf32> to vector<8xf32>
    %119 = vector.shape_cast %118 : vector<8xf32> to vector<8x1xf32>
    %120 = vector.broadcast %119 : vector<8x1xf32> to vector<8x8xf32>
    %121 = arith.subf %117, %120 : vector<8x8xf32>
    %122 = math.exp %121 : vector<8x8xf32>
    %cst_38 = arith.constant dense<0.000000e+00> : vector<8xf32>
    %123 = vector.multi_reduction <add>, %122, %cst_38 [1] : vector<8x8xf32> to vector<8xf32>
    %124 = vector.shape_cast %123 : vector<8xf32> to vector<8x1xf32>
    %125 = tpu.reciprocal %124 {approx = true} : vector<8x1xf32> -> vector<8x1xf32>
    %126 = vector.broadcast %125 : vector<8x1xf32> to vector<8x8xf32>
    %127 = arith.mulf %122, %126 : vector<8x8xf32>
    %128 = arith.truncf %127 : vector<8x8xf32> to vector<8x8xbf16>
    %129 = vector.extract_strided_slice %112 {offsets = [0, 0], sizes = [8, 8], strides = [1, 1]} : vector<8x32xbf16> to vector<8x8xbf16>
    %cst_39 = arith.constant dense<0.000000e+00> : vector<8x8xf32>
    %130 = tpu.matmul %128, %129, %cst_39 {dimension_numbers = #tpu.dot_dimension_numbers<[1], [0], [0], [1], [0, 0, 1, 1], [], []>} : vector<8x8xbf16>, vector<8x8xbf16>, vector<8x8xf32> -> vector<8x8xf32>
    %131 = arith.truncf %130 : vector<8x8xf32> to vector<8x8xbf16>
    %132 = vector.extract_strided_slice %3 {offsets = [0, 0], sizes = [8, 32], strides = [1, 1]} : vector<32x32xbf16> to vector<8x32xbf16>
    %cst_40 = arith.constant dense<0.000000e+00> : vector<8x32xf32>
    %133 = tpu.matmul %131, %132, %cst_40 {dimension_numbers = #tpu.dot_dimension_numbers<[1], [0], [0], [1], [0, 0, 1, 1], [], []>} : vector<8x8xbf16>, vector<8x32xbf16>, vector<8x32xf32> -> vector<8x32xf32>
    %134 = vector.extract_strided_slice %108 {offsets = [0, 8], sizes = [8, 8], strides = [1, 1]} : vector<8x32xbf16> to vector<8x8xbf16>
    %135 = vector.extract_strided_slice %110 {offsets = [0, 8], sizes = [8, 8], strides = [1, 1]} : vector<8x32xbf16> to vector<8x8xbf16>
    %cst_41 = arith.constant dense<0.000000e+00> : vector<8x8xf32>
    %136 = tpu.matmul %134, %135, %cst_41 {dimension_numbers = #tpu.dot_dimension_numbers<[1], [1], [0], [0], [0, 0, 1, 0], [], []>} : vector<8x8xbf16>, vector<8x8xbf16>, vector<8x8xf32> -> vector<8x8xf32>
    %cst_42 = arith.constant 0.353553385 : f32
    %137 = vector.broadcast %cst_42 : f32 to vector<8x8xf32>
    %138 = arith.mulf %136, %137 : vector<8x8xf32>
    %cst_43 = arith.constant dense<0xFF800000> : vector<8xf32>
    %139 = vector.multi_reduction <maximumf>, %138, %cst_43 [1] : vector<8x8xf32> to vector<8xf32>
    %140 = vector.shape_cast %139 : vector<8xf32> to vector<8x1xf32>
    %141 = vector.broadcast %140 : vector<8x1xf32> to vector<8x8xf32>
    %142 = arith.subf %138, %141 : vector<8x8xf32>
    %143 = math.exp %142 : vector<8x8xf32>
    %cst_44 = arith.constant dense<0.000000e+00> : vector<8xf32>
    %144 = vector.multi_reduction <add>, %143, %cst_44 [1] : vector<8x8xf32> to vector<8xf32>
    %145 = vector.shape_cast %144 : vector<8xf32> to vector<8x1xf32>
    %146 = tpu.reciprocal %145 {approx = true} : vector<8x1xf32> -> vector<8x1xf32>
    %147 = vector.broadcast %146 : vector<8x1xf32> to vector<8x8xf32>
    %148 = arith.mulf %143, %147 : vector<8x8xf32>
    %149 = arith.truncf %148 : vector<8x8xf32> to vector<8x8xbf16>
    %150 = vector.extract_strided_slice %112 {offsets = [0, 8], sizes = [8, 8], strides = [1, 1]} : vector<8x32xbf16> to vector<8x8xbf16>
    %cst_45 = arith.constant dense<0.000000e+00> : vector<8x8xf32>
    %151 = tpu.matmul %149, %150, %cst_45 {dimension_numbers = #tpu.dot_dimension_numbers<[1], [0], [0], [1], [0, 0, 1, 1], [], []>} : vector<8x8xbf16>, vector<8x8xbf16>, vector<8x8xf32> -> vector<8x8xf32>
    %152 = arith.truncf %151 : vector<8x8xf32> to vector<8x8xbf16>
    %153 = vector.extract_strided_slice %3 {offsets = [8, 0], sizes = [8, 32], strides = [1, 1]} : vector<32x32xbf16> to vector<8x32xbf16>
    %cst_46 = arith.constant dense<0.000000e+00> : vector<8x32xf32>
    %154 = tpu.matmul %152, %153, %cst_46 {dimension_numbers = #tpu.dot_dimension_numbers<[1], [0], [0], [1], [0, 0, 1, 1], [], []>} : vector<8x8xbf16>, vector<8x32xbf16>, vector<8x32xf32> -> vector<8x32xf32>
    %155 = arith.addf %133, %154 : vector<8x32xf32>
    %156 = vector.extract_strided_slice %108 {offsets = [0, 16], sizes = [8, 8], strides = [1, 1]} : vector<8x32xbf16> to vector<8x8xbf16>
    %157 = vector.extract_strided_slice %110 {offsets = [0, 16], sizes = [8, 8], strides = [1, 1]} : vector<8x32xbf16> to vector<8x8xbf16>
    %cst_47 = arith.constant dense<0.000000e+00> : vector<8x8xf32>
    %158 = tpu.matmul %156, %157, %cst_47 {dimension_numbers = #tpu.dot_dimension_numbers<[1], [1], [0], [0], [0, 0, 1, 0], [], []>} : vector<8x8xbf16>, vector<8x8xbf16>, vector<8x8xf32> -> vector<8x8xf32>
    %cst_48 = arith.constant 0.353553385 : f32
    %159 = vector.broadcast %cst_48 : f32 to vector<8x8xf32>
    %160 = arith.mulf %158, %159 : vector<8x8xf32>
    %cst_49 = arith.constant dense<0xFF800000> : vector<8xf32>
    %161 = vector.multi_reduction <maximumf>, %160, %cst_49 [1] : vector<8x8xf32> to vector<8xf32>
    %162 = vector.shape_cast %161 : vector<8xf32> to vector<8x1xf32>
    %163 = vector.broadcast %162 : vector<8x1xf32> to vector<8x8xf32>
    %164 = arith.subf %160, %163 : vector<8x8xf32>
    %165 = math.exp %164 : vector<8x8xf32>
    %cst_50 = arith.constant dense<0.000000e+00> : vector<8xf32>
    %166 = vector.multi_reduction <add>, %165, %cst_50 [1] : vector<8x8xf32> to vector<8xf32>
    %167 = vector.shape_cast %166 : vector<8xf32> to vector<8x1xf32>
    %168 = tpu.reciprocal %167 {approx = true} : vector<8x1xf32> -> vector<8x1xf32>
    %169 = vector.broadcast %168 : vector<8x1xf32> to vector<8x8xf32>
    %170 = arith.mulf %165, %169 : vector<8x8xf32>
    %171 = arith.truncf %170 : vector<8x8xf32> to vector<8x8xbf16>
    %172 = vector.extract_strided_slice %112 {offsets = [0, 16], sizes = [8, 8], strides = [1, 1]} : vector<8x32xbf16> to vector<8x8xbf16>
    %cst_51 = arith.constant dense<0.000000e+00> : vector<8x8xf32>
    %173 = tpu.matmul %171, %172, %cst_51 {dimension_numbers = #tpu.dot_dimension_numbers<[1], [0], [0], [1], [0, 0, 1, 1], [], []>} : vector<8x8xbf16>, vector<8x8xbf16>, vector<8x8xf32> -> vector<8x8xf32>
    %174 = arith.truncf %173 : vector<8x8xf32> to vector<8x8xbf16>
    %175 = vector.extract_strided_slice %3 {offsets = [16, 0], sizes = [8, 32], strides = [1, 1]} : vector<32x32xbf16> to vector<8x32xbf16>
    %cst_52 = arith.constant dense<0.000000e+00> : vector<8x32xf32>
    %176 = tpu.matmul %174, %175, %cst_52 {dimension_numbers = #tpu.dot_dimension_numbers<[1], [0], [0], [1], [0, 0, 1, 1], [], []>} : vector<8x8xbf16>, vector<8x32xbf16>, vector<8x32xf32> -> vector<8x32xf32>
    %177 = arith.addf %155, %176 : vector<8x32xf32>
    %178 = vector.extract_strided_slice %108 {offsets = [0, 24], sizes = [8, 8], strides = [1, 1]} : vector<8x32xbf16> to vector<8x8xbf16>
    %179 = vector.extract_strided_slice %110 {offsets = [0, 24], sizes = [8, 8], strides = [1, 1]} : vector<8x32xbf16> to vector<8x8xbf16>
    %cst_53 = arith.constant dense<0.000000e+00> : vector<8x8xf32>
    %180 = tpu.matmul %178, %179, %cst_53 {dimension_numbers = #tpu.dot_dimension_numbers<[1], [1], [0], [0], [0, 0, 1, 0], [], []>} : vector<8x8xbf16>, vector<8x8xbf16>, vector<8x8xf32> -> vector<8x8xf32>
    %cst_54 = arith.constant 0.353553385 : f32
    %181 = vector.broadcast %cst_54 : f32 to vector<8x8xf32>
    %182 = arith.mulf %180, %181 : vector<8x8xf32>
    %cst_55 = arith.constant dense<0xFF800000> : vector<8xf32>
    %183 = vector.multi_reduction <maximumf>, %182, %cst_55 [1] : vector<8x8xf32> to vector<8xf32>
    %184 = vector.shape_cast %183 : vector<8xf32> to vector<8x1xf32>
    %185 = vector.broadcast %184 : vector<8x1xf32> to vector<8x8xf32>
    %186 = arith.subf %182, %185 : vector<8x8xf32>
    %187 = math.exp %186 : vector<8x8xf32>
    %cst_56 = arith.constant dense<0.000000e+00> : vector<8xf32>
    %188 = vector.multi_reduction <add>, %187, %cst_56 [1] : vector<8x8xf32> to vector<8xf32>
    %189 = vector.shape_cast %188 : vector<8xf32> to vector<8x1xf32>
    %190 = tpu.reciprocal %189 {approx = true} : vector<8x1xf32> -> vector<8x1xf32>
    %191 = vector.broadcast %190 : vector<8x1xf32> to vector<8x8xf32>
    %192 = arith.mulf %187, %191 : vector<8x8xf32>
    %193 = arith.truncf %192 : vector<8x8xf32> to vector<8x8xbf16>
    %194 = vector.extract_strided_slice %112 {offsets = [0, 24], sizes = [8, 8], strides = [1, 1]} : vector<8x32xbf16> to vector<8x8xbf16>
    %cst_57 = arith.constant dense<0.000000e+00> : vector<8x8xf32>
    %195 = tpu.matmul %193, %194, %cst_57 {dimension_numbers = #tpu.dot_dimension_numbers<[1], [0], [0], [1], [0, 0, 1, 1], [], []>} : vector<8x8xbf16>, vector<8x8xbf16>, vector<8x8xf32> -> vector<8x8xf32>
    %196 = arith.truncf %195 : vector<8x8xf32> to vector<8x8xbf16>
    %197 = vector.extract_strided_slice %3 {offsets = [24, 0], sizes = [8, 32], strides = [1, 1]} : vector<32x32xbf16> to vector<8x32xbf16>
    %cst_58 = arith.constant dense<0.000000e+00> : vector<8x32xf32>
    %198 = tpu.matmul %196, %197, %cst_58 {dimension_numbers = #tpu.dot_dimension_numbers<[1], [0], [0], [1], [0, 0, 1, 1], [], []>} : vector<8x8xbf16>, vector<8x32xbf16>, vector<8x32xf32> -> vector<8x32xf32>
    %199 = arith.addf %177, %198 : vector<8x32xf32>
    %200 = vector.broadcast %4 : vector<1x32xf32> to vector<8x32xf32>
    %201 = arith.addf %199, %200 : vector<8x32xf32>
    %c0_59 = arith.constant 0 : index
    %c8 = arith.constant 8 : index
    %c0_60 = arith.constant 0 : index
    %202 = vector.load %arg5[%c0_59, %c8, %c0_60] : memref<1x32x32xf32, #tpu.memory_space<vmem>>, vector<1x8x32xf32>
    %203 = vector.shape_cast %202 : vector<1x8x32xf32> to vector<8x32xf32>
    %204 = vector.shape_cast %201 : vector<8x32xf32> to vector<1x8x32xf32>
    tpu.vector_store %arg5[%c0_59, %c8, %c0_60], %204 {strides = array<i32>} : memref<1x32x32xf32, #tpu.memory_space<vmem>>, vector<1x8x32xf32>,
    %205 = vector.extract_strided_slice %6 {offsets = [16, 0], sizes = [8, 96], strides = [1, 1]} : vector<32x96xf32> to vector<8x96xf32>
    %206 = vector.extract_strided_slice %205 {offsets = [0, 0], sizes = [8, 32], strides = [1, 1]} : vector<8x96xf32> to vector<8x32xf32>
    %207 = arith.truncf %206 : vector<8x32xf32> to vector<8x32xbf16>
    %208 = vector.extract_strided_slice %205 {offsets = [0, 32], sizes = [8, 32], strides = [1, 1]} : vector<8x96xf32> to vector<8x32xf32>
    %209 = arith.truncf %208 : vector<8x32xf32> to vector<8x32xbf16>
    %210 = vector.extract_strided_slice %205 {offsets = [0, 64], sizes = [8, 32], strides = [1, 1]} : vector<8x96xf32> to vector<8x32xf32>
    %211 = arith.truncf %210 : vector<8x32xf32> to vector<8x32xbf16>
    %212 = vector.extract_strided_slice %207 {offsets = [0, 0], sizes = [8, 8], strides = [1, 1]} : vector<8x32xbf16> to vector<8x8xbf16>
    %213 = vector.extract_strided_slice %209 {offsets = [0, 0], sizes = [8, 8], strides = [1, 1]} : vector<8x32xbf16> to vector<8x8xbf16>
    %cst_61 = arith.constant dense<0.000000e+00> : vector<8x8xf32>
    %214 = tpu.matmul %212, %213, %cst_61 {dimension_numbers = #tpu.dot_dimension_numbers<[1], [1], [0], [0], [0, 0, 1, 0], [], []>} : vector<8x8xbf16>, vector<8x8xbf16>, vector<8x8xf32> -> vector<8x8xf32>
    %cst_62 = arith.constant 0.353553385 : f32
    %215 = vector.broadcast %cst_62 : f32 to vector<8x8xf32>
    %216 = arith.mulf %214, %215 : vector<8x8xf32>
    %cst_63 = arith.constant dense<0xFF800000> : vector<8xf32>
    %217 = vector.multi_reduction <maximumf>, %216, %cst_63 [1] : vector<8x8xf32> to vector<8xf32>
    %218 = vector.shape_cast %217 : vector<8xf32> to vector<8x1xf32>
    %219 = vector.broadcast %218 : vector<8x1xf32> to vector<8x8xf32>
    %220 = arith.subf %216, %219 : vector<8x8xf32>
    %221 = math.exp %220 : vector<8x8xf32>
    %cst_64 = arith.constant dense<0.000000e+00> : vector<8xf32>
    %222 = vector.multi_reduction <add>, %221, %cst_64 [1] : vector<8x8xf32> to vector<8xf32>
    %223 = vector.shape_cast %222 : vector<8xf32> to vector<8x1xf32>
    %224 = tpu.reciprocal %223 {approx = true} : vector<8x1xf32> -> vector<8x1xf32>
    %225 = vector.broadcast %224 : vector<8x1xf32> to vector<8x8xf32>
    %226 = arith.mulf %221, %225 : vector<8x8xf32>
    %227 = arith.truncf %226 : vector<8x8xf32> to vector<8x8xbf16>
    %228 = vector.extract_strided_slice %211 {offsets = [0, 0], sizes = [8, 8], strides = [1, 1]} : vector<8x32xbf16> to vector<8x8xbf16>
    %cst_65 = arith.constant dense<0.000000e+00> : vector<8x8xf32>
    %229 = tpu.matmul %227, %228, %cst_65 {dimension_numbers = #tpu.dot_dimension_numbers<[1], [0], [0], [1], [0, 0, 1, 1], [], []>} : vector<8x8xbf16>, vector<8x8xbf16>, vector<8x8xf32> -> vector<8x8xf32>
    %230 = arith.truncf %229 : vector<8x8xf32> to vector<8x8xbf16>
    %231 = vector.extract_strided_slice %3 {offsets = [0, 0], sizes = [8, 32], strides = [1, 1]} : vector<32x32xbf16> to vector<8x32xbf16>
    %cst_66 = arith.constant dense<0.000000e+00> : vector<8x32xf32>
    %232 = tpu.matmul %230, %231, %cst_66 {dimension_numbers = #tpu.dot_dimension_numbers<[1], [0], [0], [1], [0, 0, 1, 1], [], []>} : vector<8x8xbf16>, vector<8x32xbf16>, vector<8x32xf32> -> vector<8x32xf32>
    %233 = vector.extract_strided_slice %207 {offsets = [0, 8], sizes = [8, 8], strides = [1, 1]} : vector<8x32xbf16> to vector<8x8xbf16>
    %234 = vector.extract_strided_slice %209 {offsets = [0, 8], sizes = [8, 8], strides = [1, 1]} : vector<8x32xbf16> to vector<8x8xbf16>
    %cst_67 = arith.constant dense<0.000000e+00> : vector<8x8xf32>
    %235 = tpu.matmul %233, %234, %cst_67 {dimension_numbers = #tpu.dot_dimension_numbers<[1], [1], [0], [0], [0, 0, 1, 0], [], []>} : vector<8x8xbf16>, vector<8x8xbf16>, vector<8x8xf32> -> vector<8x8xf32>
    %cst_68 = arith.constant 0.353553385 : f32
    %236 = vector.broadcast %cst_68 : f32 to vector<8x8xf32>
    %237 = arith.mulf %235, %236 : vector<8x8xf32>
    %cst_69 = arith.constant dense<0xFF800000> : vector<8xf32>
    %238 = vector.multi_reduction <maximumf>, %237, %cst_69 [1] : vector<8x8xf32> to vector<8xf32>
    %239 = vector.shape_cast %238 : vector<8xf32> to vector<8x1xf32>
    %240 = vector.broadcast %239 : vector<8x1xf32> to vector<8x8xf32>
    %241 = arith.subf %237, %240 : vector<8x8xf32>
    %242 = math.exp %241 : vector<8x8xf32>
    %cst_70 = arith.constant dense<0.000000e+00> : vector<8xf32>
    %243 = vector.multi_reduction <add>, %242, %cst_70 [1] : vector<8x8xf32> to vector<8xf32>
    %244 = vector.shape_cast %243 : vector<8xf32> to vector<8x1xf32>
    %245 = tpu.reciprocal %244 {approx = true} : vector<8x1xf32> -> vector<8x1xf32>
    %246 = vector.broadcast %245 : vector<8x1xf32> to vector<8x8xf32>
    %247 = arith.mulf %242, %246 : vector<8x8xf32>
    %248 = arith.truncf %247 : vector<8x8xf32> to vector<8x8xbf16>
    %249 = vector.extract_strided_slice %211 {offsets = [0, 8], sizes = [8, 8], strides = [1, 1]} : vector<8x32xbf16> to vector<8x8xbf16>
    %cst_71 = arith.constant dense<0.000000e+00> : vector<8x8xf32>
    %250 = tpu.matmul %248, %249, %cst_71 {dimension_numbers = #tpu.dot_dimension_numbers<[1], [0], [0], [1], [0, 0, 1, 1], [], []>} : vector<8x8xbf16>, vector<8x8xbf16>, vector<8x8xf32> -> vector<8x8xf32>
    %251 = arith.truncf %250 : vector<8x8xf32> to vector<8x8xbf16>
    %252 = vector.extract_strided_slice %3 {offsets = [8, 0], sizes = [8, 32], strides = [1, 1]} : vector<32x32xbf16> to vector<8x32xbf16>
    %cst_72 = arith.constant dense<0.000000e+00> : vector<8x32xf32>
    %253 = tpu.matmul %251, %252, %cst_72 {dimension_numbers = #tpu.dot_dimension_numbers<[1], [0], [0], [1], [0, 0, 1, 1], [], []>} : vector<8x8xbf16>, vector<8x32xbf16>, vector<8x32xf32> -> vector<8x32xf32>
    %254 = arith.addf %232, %253 : vector<8x32xf32>
    %255 = vector.extract_strided_slice %207 {offsets = [0, 16], sizes = [8, 8], strides = [1, 1]} : vector<8x32xbf16> to vector<8x8xbf16>
    %256 = vector.extract_strided_slice %209 {offsets = [0, 16], sizes = [8, 8], strides = [1, 1]} : vector<8x32xbf16> to vector<8x8xbf16>
    %cst_73 = arith.constant dense<0.000000e+00> : vector<8x8xf32>
    %257 = tpu.matmul %255, %256, %cst_73 {dimension_numbers = #tpu.dot_dimension_numbers<[1], [1], [0], [0], [0, 0, 1, 0], [], []>} : vector<8x8xbf16>, vector<8x8xbf16>, vector<8x8xf32> -> vector<8x8xf32>
    %cst_74 = arith.constant 0.353553385 : f32
    %258 = vector.broadcast %cst_74 : f32 to vector<8x8xf32>
    %259 = arith.mulf %257, %258 : vector<8x8xf32>
    %cst_75 = arith.constant dense<0xFF800000> : vector<8xf32>
    %260 = vector.multi_reduction <maximumf>, %259, %cst_75 [1] : vector<8x8xf32> to vector<8xf32>
    %261 = vector.shape_cast %260 : vector<8xf32> to vector<8x1xf32>
    %262 = vector.broadcast %261 : vector<8x1xf32> to vector<8x8xf32>
    %263 = arith.subf %259, %262 : vector<8x8xf32>
    %264 = math.exp %263 : vector<8x8xf32>
    %cst_76 = arith.constant dense<0.000000e+00> : vector<8xf32>
    %265 = vector.multi_reduction <add>, %264, %cst_76 [1] : vector<8x8xf32> to vector<8xf32>
    %266 = vector.shape_cast %265 : vector<8xf32> to vector<8x1xf32>
    %267 = tpu.reciprocal %266 {approx = true} : vector<8x1xf32> -> vector<8x1xf32>
    %268 = vector.broadcast %267 : vector<8x1xf32> to vector<8x8xf32>
    %269 = arith.mulf %264, %268 : vector<8x8xf32>
    %270 = arith.truncf %269 : vector<8x8xf32> to vector<8x8xbf16>
    %271 = vector.extract_strided_slice %211 {offsets = [0, 16], sizes = [8, 8], strides = [1, 1]} : vector<8x32xbf16> to vector<8x8xbf16>
    %cst_77 = arith.constant dense<0.000000e+00> : vector<8x8xf32>
    %272 = tpu.matmul %270, %271, %cst_77 {dimension_numbers = #tpu.dot_dimension_numbers<[1], [0], [0], [1], [0, 0, 1, 1], [], []>} : vector<8x8xbf16>, vector<8x8xbf16>, vector<8x8xf32> -> vector<8x8xf32>
    %273 = arith.truncf %272 : vector<8x8xf32> to vector<8x8xbf16>
    %274 = vector.extract_strided_slice %3 {offsets = [16, 0], sizes = [8, 32], strides = [1, 1]} : vector<32x32xbf16> to vector<8x32xbf16>
    %cst_78 = arith.constant dense<0.000000e+00> : vector<8x32xf32>
    %275 = tpu.matmul %273, %274, %cst_78 {dimension_numbers = #tpu.dot_dimension_numbers<[1], [0], [0], [1], [0, 0, 1, 1], [], []>} : vector<8x8xbf16>, vector<8x32xbf16>, vector<8x32xf32> -> vector<8x32xf32>
    %276 = arith.addf %254, %275 : vector<8x32xf32>
    %277 = vector.extract_strided_slice %207 {offsets = [0, 24], sizes = [8, 8], strides = [1, 1]} : vector<8x32xbf16> to vector<8x8xbf16>
    %278 = vector.extract_strided_slice %209 {offsets = [0, 24], sizes = [8, 8], strides = [1, 1]} : vector<8x32xbf16> to vector<8x8xbf16>
    %cst_79 = arith.constant dense<0.000000e+00> : vector<8x8xf32>
    %279 = tpu.matmul %277, %278, %cst_79 {dimension_numbers = #tpu.dot_dimension_numbers<[1], [1], [0], [0], [0, 0, 1, 0], [], []>} : vector<8x8xbf16>, vector<8x8xbf16>, vector<8x8xf32> -> vector<8x8xf32>
    %cst_80 = arith.constant 0.353553385 : f32
    %280 = vector.broadcast %cst_80 : f32 to vector<8x8xf32>
    %281 = arith.mulf %279, %280 : vector<8x8xf32>
    %cst_81 = arith.constant dense<0xFF800000> : vector<8xf32>
    %282 = vector.multi_reduction <maximumf>, %281, %cst_81 [1] : vector<8x8xf32> to vector<8xf32>
    %283 = vector.shape_cast %282 : vector<8xf32> to vector<8x1xf32>
    %284 = vector.broadcast %283 : vector<8x1xf32> to vector<8x8xf32>
    %285 = arith.subf %281, %284 : vector<8x8xf32>
    %286 = math.exp %285 : vector<8x8xf32>
    %cst_82 = arith.constant dense<0.000000e+00> : vector<8xf32>
    %287 = vector.multi_reduction <add>, %286, %cst_82 [1] : vector<8x8xf32> to vector<8xf32>
    %288 = vector.shape_cast %287 : vector<8xf32> to vector<8x1xf32>
    %289 = tpu.reciprocal %288 {approx = true} : vector<8x1xf32> -> vector<8x1xf32>
    %290 = vector.broadcast %289 : vector<8x1xf32> to vector<8x8xf32>
    %291 = arith.mulf %286, %290 : vector<8x8xf32>
    %292 = arith.truncf %291 : vector<8x8xf32> to vector<8x8xbf16>
    %293 = vector.extract_strided_slice %211 {offsets = [0, 24], sizes = [8, 8], strides = [1, 1]} : vector<8x32xbf16> to vector<8x8xbf16>
    %cst_83 = arith.constant dense<0.000000e+00> : vector<8x8xf32>
    %294 = tpu.matmul %292, %293, %cst_83 {dimension_numbers = #tpu.dot_dimension_numbers<[1], [0], [0], [1], [0, 0, 1, 1], [], []>} : vector<8x8xbf16>, vector<8x8xbf16>, vector<8x8xf32> -> vector<8x8xf32>
    %295 = arith.truncf %294 : vector<8x8xf32> to vector<8x8xbf16>
    %296 = vector.extract_strided_slice %3 {offsets = [24, 0], sizes = [8, 32], strides = [1, 1]} : vector<32x32xbf16> to vector<8x32xbf16>
    %cst_84 = arith.constant dense<0.000000e+00> : vector<8x32xf32>
    %297 = tpu.matmul %295, %296, %cst_84 {dimension_numbers = #tpu.dot_dimension_numbers<[1], [0], [0], [1], [0, 0, 1, 1], [], []>} : vector<8x8xbf16>, vector<8x32xbf16>, vector<8x32xf32> -> vector<8x32xf32>
    %298 = arith.addf %276, %297 : vector<8x32xf32>
    %299 = vector.broadcast %4 : vector<1x32xf32> to vector<8x32xf32>
    %300 = arith.addf %298, %299 : vector<8x32xf32>
    %c0_85 = arith.constant 0 : index
    %c16 = arith.constant 16 : index
    %c0_86 = arith.constant 0 : index
    %301 = vector.load %arg5[%c0_85, %c16, %c0_86] : memref<1x32x32xf32, #tpu.memory_space<vmem>>, vector<1x8x32xf32>
    %302 = vector.shape_cast %301 : vector<1x8x32xf32> to vector<8x32xf32>
    %303 = vector.shape_cast %300 : vector<8x32xf32> to vector<1x8x32xf32>
    tpu.vector_store %arg5[%c0_85, %c16, %c0_86], %303 {strides = array<i32>} : memref<1x32x32xf32, #tpu.memory_space<vmem>>, vector<1x8x32xf32>,
    %304 = vector.extract_strided_slice %6 {offsets = [24, 0], sizes = [8, 96], strides = [1, 1]} : vector<32x96xf32> to vector<8x96xf32>
    %305 = vector.extract_strided_slice %304 {offsets = [0, 0], sizes = [8, 32], strides = [1, 1]} : vector<8x96xf32> to vector<8x32xf32>
    %306 = arith.truncf %305 : vector<8x32xf32> to vector<8x32xbf16>
    %307 = vector.extract_strided_slice %304 {offsets = [0, 32], sizes = [8, 32], strides = [1, 1]} : vector<8x96xf32> to vector<8x32xf32>
    %308 = arith.truncf %307 : vector<8x32xf32> to vector<8x32xbf16>
    %309 = vector.extract_strided_slice %304 {offsets = [0, 64], sizes = [8, 32], strides = [1, 1]} : vector<8x96xf32> to vector<8x32xf32>
    %310 = arith.truncf %309 : vector<8x32xf32> to vector<8x32xbf16>
    %311 = vector.extract_strided_slice %306 {offsets = [0, 0], sizes = [8, 8], strides = [1, 1]} : vector<8x32xbf16> to vector<8x8xbf16>
    %312 = vector.extract_strided_slice %308 {offsets = [0, 0], sizes = [8, 8], strides = [1, 1]} : vector<8x32xbf16> to vector<8x8xbf16>
    %cst_87 = arith.constant dense<0.000000e+00> : vector<8x8xf32>
    %313 = tpu.matmul %311, %312, %cst_87 {dimension_numbers = #tpu.dot_dimension_numbers<[1], [1], [0], [0], [0, 0, 1, 0], [], []>} : vector<8x8xbf16>, vector<8x8xbf16>, vector<8x8xf32> -> vector<8x8xf32>
    %cst_88 = arith.constant 0.353553385 : f32
    %314 = vector.broadcast %cst_88 : f32 to vector<8x8xf32>
    %315 = arith.mulf %313, %314 : vector<8x8xf32>
    %cst_89 = arith.constant dense<0xFF800000> : vector<8xf32>
    %316 = vector.multi_reduction <maximumf>, %315, %cst_89 [1] : vector<8x8xf32> to vector<8xf32>
    %317 = vector.shape_cast %316 : vector<8xf32> to vector<8x1xf32>
    %318 = vector.broadcast %317 : vector<8x1xf32> to vector<8x8xf32>
    %319 = arith.subf %315, %318 : vector<8x8xf32>
    %320 = math.exp %319 : vector<8x8xf32>
    %cst_90 = arith.constant dense<0.000000e+00> : vector<8xf32>
    %321 = vector.multi_reduction <add>, %320, %cst_90 [1] : vector<8x8xf32> to vector<8xf32>
    %322 = vector.shape_cast %321 : vector<8xf32> to vector<8x1xf32>
    %323 = tpu.reciprocal %322 {approx = true} : vector<8x1xf32> -> vector<8x1xf32>
    %324 = vector.broadcast %323 : vector<8x1xf32> to vector<8x8xf32>
    %325 = arith.mulf %320, %324 : vector<8x8xf32>
    %326 = arith.truncf %325 : vector<8x8xf32> to vector<8x8xbf16>
    %327 = vector.extract_strided_slice %310 {offsets = [0, 0], sizes = [8, 8], strides = [1, 1]} : vector<8x32xbf16> to vector<8x8xbf16>
    %cst_91 = arith.constant dense<0.000000e+00> : vector<8x8xf32>
    %328 = tpu.matmul %326, %327, %cst_91 {dimension_numbers = #tpu.dot_dimension_numbers<[1], [0], [0], [1], [0, 0, 1, 1], [], []>} : vector<8x8xbf16>, vector<8x8xbf16>, vector<8x8xf32> -> vector<8x8xf32>
    %329 = arith.truncf %328 : vector<8x8xf32> to vector<8x8xbf16>
    %330 = vector.extract_strided_slice %3 {offsets = [0, 0], sizes = [8, 32], strides = [1, 1]} : vector<32x32xbf16> to vector<8x32xbf16>
    %cst_92 = arith.constant dense<0.000000e+00> : vector<8x32xf32>
    %331 = tpu.matmul %329, %330, %cst_92 {dimension_numbers = #tpu.dot_dimension_numbers<[1], [0], [0], [1], [0, 0, 1, 1], [], []>} : vector<8x8xbf16>, vector<8x32xbf16>, vector<8x32xf32> -> vector<8x32xf32>
    %332 = vector.extract_strided_slice %306 {offsets = [0, 8], sizes = [8, 8], strides = [1, 1]} : vector<8x32xbf16> to vector<8x8xbf16>
    %333 = vector.extract_strided_slice %308 {offsets = [0, 8], sizes = [8, 8], strides = [1, 1]} : vector<8x32xbf16> to vector<8x8xbf16>
    %cst_93 = arith.constant dense<0.000000e+00> : vector<8x8xf32>
    %334 = tpu.matmul %332, %333, %cst_93 {dimension_numbers = #tpu.dot_dimension_numbers<[1], [1], [0], [0], [0, 0, 1, 0], [], []>} : vector<8x8xbf16>, vector<8x8xbf16>, vector<8x8xf32> -> vector<8x8xf32>
    %cst_94 = arith.constant 0.353553385 : f32
    %335 = vector.broadcast %cst_94 : f32 to vector<8x8xf32>
    %336 = arith.mulf %334, %335 : vector<8x8xf32>
    %cst_95 = arith.constant dense<0xFF800000> : vector<8xf32>
    %337 = vector.multi_reduction <maximumf>, %336, %cst_95 [1] : vector<8x8xf32> to vector<8xf32>
    %338 = vector.shape_cast %337 : vector<8xf32> to vector<8x1xf32>
    %339 = vector.broadcast %338 : vector<8x1xf32> to vector<8x8xf32>
    %340 = arith.subf %336, %339 : vector<8x8xf32>
    %341 = math.exp %340 : vector<8x8xf32>
    %cst_96 = arith.constant dense<0.000000e+00> : vector<8xf32>
    %342 = vector.multi_reduction <add>, %341, %cst_96 [1] : vector<8x8xf32> to vector<8xf32>
    %343 = vector.shape_cast %342 : vector<8xf32> to vector<8x1xf32>
    %344 = tpu.reciprocal %343 {approx = true} : vector<8x1xf32> -> vector<8x1xf32>
    %345 = vector.broadcast %344 : vector<8x1xf32> to vector<8x8xf32>
    %346 = arith.mulf %341, %345 : vector<8x8xf32>
    %347 = arith.truncf %346 : vector<8x8xf32> to vector<8x8xbf16>
    %348 = vector.extract_strided_slice %310 {offsets = [0, 8], sizes = [8, 8], strides = [1, 1]} : vector<8x32xbf16> to vector<8x8xbf16>
    %cst_97 = arith.constant dense<0.000000e+00> : vector<8x8xf32>
    %349 = tpu.matmul %347, %348, %cst_97 {dimension_numbers = #tpu.dot_dimension_numbers<[1], [0], [0], [1], [0, 0, 1, 1], [], []>} : vector<8x8xbf16>, vector<8x8xbf16>, vector<8x8xf32> -> vector<8x8xf32>
    %350 = arith.truncf %349 : vector<8x8xf32> to vector<8x8xbf16>
    %351 = vector.extract_strided_slice %3 {offsets = [8, 0], sizes = [8, 32], strides = [1, 1]} : vector<32x32xbf16> to vector<8x32xbf16>
    %cst_98 = arith.constant dense<0.000000e+00> : vector<8x32xf32>
    %352 = tpu.matmul %350, %351, %cst_98 {dimension_numbers = #tpu.dot_dimension_numbers<[1], [0], [0], [1], [0, 0, 1, 1], [], []>} : vector<8x8xbf16>, vector<8x32xbf16>, vector<8x32xf32> -> vector<8x32xf32>
    %353 = arith.addf %331, %352 : vector<8x32xf32>
    %354 = vector.extract_strided_slice %306 {offsets = [0, 16], sizes = [8, 8], strides = [1, 1]} : vector<8x32xbf16> to vector<8x8xbf16>
    %355 = vector.extract_strided_slice %308 {offsets = [0, 16], sizes = [8, 8], strides = [1, 1]} : vector<8x32xbf16> to vector<8x8xbf16>
    %cst_99 = arith.constant dense<0.000000e+00> : vector<8x8xf32>
    %356 = tpu.matmul %354, %355, %cst_99 {dimension_numbers = #tpu.dot_dimension_numbers<[1], [1], [0], [0], [0, 0, 1, 0], [], []>} : vector<8x8xbf16>, vector<8x8xbf16>, vector<8x8xf32> -> vector<8x8xf32>
    %cst_100 = arith.constant 0.353553385 : f32
    %357 = vector.broadcast %cst_100 : f32 to vector<8x8xf32>
    %358 = arith.mulf %356, %357 : vector<8x8xf32>
    %cst_101 = arith.constant dense<0xFF800000> : vector<8xf32>
    %359 = vector.multi_reduction <maximumf>, %358, %cst_101 [1] : vector<8x8xf32> to vector<8xf32>
    %360 = vector.shape_cast %359 : vector<8xf32> to vector<8x1xf32>
    %361 = vector.broadcast %360 : vector<8x1xf32> to vector<8x8xf32>
    %362 = arith.subf %358, %361 : vector<8x8xf32>
    %363 = math.exp %362 : vector<8x8xf32>
    %cst_102 = arith.constant dense<0.000000e+00> : vector<8xf32>
    %364 = vector.multi_reduction <add>, %363, %cst_102 [1] : vector<8x8xf32> to vector<8xf32>
    %365 = vector.shape_cast %364 : vector<8xf32> to vector<8x1xf32>
    %366 = tpu.reciprocal %365 {approx = true} : vector<8x1xf32> -> vector<8x1xf32>
    %367 = vector.broadcast %366 : vector<8x1xf32> to vector<8x8xf32>
    %368 = arith.mulf %363, %367 : vector<8x8xf32>
    %369 = arith.truncf %368 : vector<8x8xf32> to vector<8x8xbf16>
    %370 = vector.extract_strided_slice %310 {offsets = [0, 16], sizes = [8, 8], strides = [1, 1]} : vector<8x32xbf16> to vector<8x8xbf16>
    %cst_103 = arith.constant dense<0.000000e+00> : vector<8x8xf32>
    %371 = tpu.matmul %369, %370, %cst_103 {dimension_numbers = #tpu.dot_dimension_numbers<[1], [0], [0], [1], [0, 0, 1, 1], [], []>} : vector<8x8xbf16>, vector<8x8xbf16>, vector<8x8xf32> -> vector<8x8xf32>
    %372 = arith.truncf %371 : vector<8x8xf32> to vector<8x8xbf16>
    %373 = vector.extract_strided_slice %3 {offsets = [16, 0], sizes = [8, 32], strides = [1, 1]} : vector<32x32xbf16> to vector<8x32xbf16>
    %cst_104 = arith.constant dense<0.000000e+00> : vector<8x32xf32>
    %374 = tpu.matmul %372, %373, %cst_104 {dimension_numbers = #tpu.dot_dimension_numbers<[1], [0], [0], [1], [0, 0, 1, 1], [], []>} : vector<8x8xbf16>, vector<8x32xbf16>, vector<8x32xf32> -> vector<8x32xf32>
    %375 = arith.addf %353, %374 : vector<8x32xf32>
    %376 = vector.extract_strided_slice %306 {offsets = [0, 24], sizes = [8, 8], strides = [1, 1]} : vector<8x32xbf16> to vector<8x8xbf16>
    %377 = vector.extract_strided_slice %308 {offsets = [0, 24], sizes = [8, 8], strides = [1, 1]} : vector<8x32xbf16> to vector<8x8xbf16>
    %cst_105 = arith.constant dense<0.000000e+00> : vector<8x8xf32>
    %378 = tpu.matmul %376, %377, %cst_105 {dimension_numbers = #tpu.dot_dimension_numbers<[1], [1], [0], [0], [0, 0, 1, 0], [], []>} : vector<8x8xbf16>, vector<8x8xbf16>, vector<8x8xf32> -> vector<8x8xf32>
    %cst_106 = arith.constant 0.353553385 : f32
    %379 = vector.broadcast %cst_106 : f32 to vector<8x8xf32>
    %380 = arith.mulf %378, %379 : vector<8x8xf32>
    %cst_107 = arith.constant dense<0xFF800000> : vector<8xf32>
    %381 = vector.multi_reduction <maximumf>, %380, %cst_107 [1] : vector<8x8xf32> to vector<8xf32>
    %382 = vector.shape_cast %381 : vector<8xf32> to vector<8x1xf32>
    %383 = vector.broadcast %382 : vector<8x1xf32> to vector<8x8xf32>
    %384 = arith.subf %380, %383 : vector<8x8xf32>
    %385 = math.exp %384 : vector<8x8xf32>
    %cst_108 = arith.constant dense<0.000000e+00> : vector<8xf32>
    %386 = vector.multi_reduction <add>, %385, %cst_108 [1] : vector<8x8xf32> to vector<8xf32>
    %387 = vector.shape_cast %386 : vector<8xf32> to vector<8x1xf32>
    %388 = tpu.reciprocal %387 {approx = true} : vector<8x1xf32> -> vector<8x1xf32>
    %389 = vector.broadcast %388 : vector<8x1xf32> to vector<8x8xf32>
    %390 = arith.mulf %385, %389 : vector<8x8xf32>
    %391 = arith.truncf %390 : vector<8x8xf32> to vector<8x8xbf16>
    %392 = vector.extract_strided_slice %310 {offsets = [0, 24], sizes = [8, 8], strides = [1, 1]} : vector<8x32xbf16> to vector<8x8xbf16>
    %cst_109 = arith.constant dense<0.000000e+00> : vector<8x8xf32>
    %393 = tpu.matmul %391, %392, %cst_109 {dimension_numbers = #tpu.dot_dimension_numbers<[1], [0], [0], [1], [0, 0, 1, 1], [], []>} : vector<8x8xbf16>, vector<8x8xbf16>, vector<8x8xf32> -> vector<8x8xf32>
    %394 = arith.truncf %393 : vector<8x8xf32> to vector<8x8xbf16>
    %395 = vector.extract_strided_slice %3 {offsets = [24, 0], sizes = [8, 32], strides = [1, 1]} : vector<32x32xbf16> to vector<8x32xbf16>
    %cst_110 = arith.constant dense<0.000000e+00> : vector<8x32xf32>
    %396 = tpu.matmul %394, %395, %cst_110 {dimension_numbers = #tpu.dot_dimension_numbers<[1], [0], [0], [1], [0, 0, 1, 1], [], []>} : vector<8x8xbf16>, vector<8x32xbf16>, vector<8x32xf32> -> vector<8x32xf32>
    %397 = arith.addf %375, %396 : vector<8x32xf32>
    %398 = vector.broadcast %4 : vector<1x32xf32> to vector<8x32xf32>
    %399 = arith.addf %397, %398 : vector<8x32xf32>
    %c0_111 = arith.constant 0 : index
    %c24 = arith.constant 24 : index
    %c0_112 = arith.constant 0 : index
    %400 = vector.load %arg5[%c0_111, %c24, %c0_112] : memref<1x32x32xf32, #tpu.memory_space<vmem>>, vector<1x8x32xf32>
    %401 = vector.shape_cast %400 : vector<1x8x32xf32> to vector<8x32xf32>
    %402 = vector.shape_cast %399 : vector<8x32xf32> to vector<1x8x32xf32>
    tpu.vector_store %arg5[%c0_111, %c24, %c0_112], %402 {strides = array<i32>} : memref<1x32x32xf32, #tpu.memory_space<vmem>>, vector<1x8x32xf32>,
    return
  }
  func.func @transform_0(%arg0: i32) -> (i32, i32, i32) {
    %c0_i32 = arith.constant 0 : i32
    %c0_i32_0 = arith.constant 0 : i32
    %c0_i32_1 = arith.constant 0 : i32
    return %arg0, %c0_i32, %c0_i32_0 : i32, i32, i32
  }
  func.func @transform_1(%arg0: i32) -> (i32, i32) {
    %c0_i32 = arith.constant 0 : i32
    %c0_i32_0 = arith.constant 0 : i32
    %c0_i32_1 = arith.constant 0 : i32
    return %c0_i32, %c0_i32_0 : i32, i32
  }
  func.func @transform_2(%arg0: i32) -> (i32, i32) {
    %c0_i32 = arith.constant 0 : i32
    %c0_i32_0 = arith.constant 0 : i32
    %c0_i32_1 = arith.constant 0 : i32
    return %c0_i32, %c0_i32_0 : i32, i32
  }
  func.func @transform_3(%arg0: i32) -> (i32, i32) {
    %c0_i32 = arith.constant 0 : i32
    %c0_i32_0 = arith.constant 0 : i32
    %c0_i32_1 = arith.constant 0 : i32
    return %c0_i32, %c0_i32_0 : i32, i32
  }
  func.func @transform_4(%arg0: i32) -> (i32, i32, i32) {
    %c0_i32 = arith.constant 0 : i32
    %c0_i32_0 = arith.constant 0 : i32
    %c0_i32_1 = arith.constant 0 : i32
    return %arg0, %c0_i32, %c0_i32_0 : i32, i32, i32
  }
}

</mosaic_0001>

<bundles_post_ra>
// kernel: tpu_custom_call.1
= control target key start
LH: loop header
LB: loop body
LE: loop exit
PB: predicated region body
PF: predicated region fallthrough
CT: control target
= control target key end

     0   :  { %9 = vsyncpa [#allocation3], 0  ;;  %s4458_s0 = inlined_call_operand.hbm [shape: f32[2,32,32], index: 0, kind: input, shape index: {}]   ;;  %s4459_s1 = inlined_call_operand.hbm [shape: bf16[32,96], index: 1, kind: input, shape index: {}]   ;;  %s4460_s2 = inlined_call_operand.hbm [shape: bf16[32,32], index: 2, kind: input, shape index: {}]   ;;  %s4461_s3 = inlined_call_operand.vmem [shape: f32[1,32], index: 3, kind: input, shape index: {}]   ;;  %s4462_s4 = inlined_call_operand.hbm [shape: f32[2,32,32], index: 4, kind: output, shape index: {}]  }
   0x1   :  { %11 = vsyncpa [#allocation3 + $0x1], 0 }
   0x2   :  { %12 = vsyncpa [#allocation6], 0 }
   0x3   :  { %13 = vsyncpa [#allocation4], 0 }
   0x4   :  { %15 = vsyncpa [#allocation4 + $0x1], 0  ;;  %s3779_s15 = smov 0   ;;  %s3781_s16 = smov 0  }
   0x5   :  { %s3783_s17 = smov 0   ;;  %s3785_s18 = smov 0  }
   0x6 LB: > { %s3800_s19 = sadd.s32 4294967295, %s3729_s18   ;;  %s2951_s20 = sadd.s32 4294967294, %s3729_s18   ;;  %s3729_s18 = sphi %s3785_s18, %s4482_s18   ;;  %s3725_s17 = sphi %s3783_s17, %s4481_s17   ;;  %s3721_s16 = sphi %s3781_s16, %s4480_s16   ;;  %s3717_s15 = sphi %s3779_s15, %s4479_s15  }
   0x7   : > { %p41_p0 = scmp.ne.s32.totalorder %s3721_s16, %s3717_s15  ;;  %p4463_p1 = scmp.eq.s32.totalorder %s3800_s19, 0 }
   0x8   : > { %p134_p3 = scmp.eq.s32.totalorder %s2951_s20, 1  ;;  %p2952_p5 = scmp.ge.s32.totalorder %s3729_s18, 1 }
   0x9   : > { %p3809_p4 = por %p4463_p1, %p41_p0  ;;  %p141_p7 = scmp.lt.s32.totalorder %s3729_s18, 3 }
   0xa   : > { %p3814_p6 = por %p134_p3, %p41_p0  ;;  %s3731_s24 = smov [#allocation5]  }
   0xb   : > { %s4466_s21 = scalar_select %p3809_p4, 1, 0 }
   0xc   : > { %s4467_s22 = scalar_select %p3814_p6, 1, 0 }
   0xd   : > { %p3819_p8 = pnand %p2952_p5, %p141_p7  ;;  %s153_s25 = sshll.u32 %s3731_s24, 4  ;;  %s3823_s25 = int_to_ptr.vmem [resolvable:$true] %s153_s25 }
   0xe   : > { %s3732_s27 = smov [#allocation7]   ;;  %s3573_s5 = scalar_lea.hbm %s4459_s1, 256 }
   0xf   : > { %p3432_p9 = pneg %p3819_p8  ;;  %s166_s28 = sshll.u32 %s3732_s27, 4  ;;  %s3834_s28 = int_to_ptr.vmem [resolvable:$true] %s166_s28 }
  0x10   : > { %p3574_p12 = scmp.ne.s32.totalorder %s4459_s1, %s3573_s5  ;;  %p3580_p5 = scmp.lt.u32.totalorder %s3573_s5, %s4459_s1 }
  0x11   : > { %p3830_p11 = pnand %p3432_p9, %p4463_p1 }
  0x13   : > { %p3575_p13 = pneg %p3830_p11 }
  0x15   : > { %p3576_p0 = pnand %p3575_p13, %p3574_p12 }
  0x17   : > { %p3577_p3 = pneg %p3576_p0 }
  0x19   : > { %p3582_p7 = pnand %p3580_p5, %p3577_p3 }
  0x1b   : > { %3585 = shalt.err (!%p3582_p7)
}
  0x1c   : > { %s3586_s10 = scalar_lea.vmem %s3823_s25, 256  ;;  %p3594_p2 = scmp.lt.s32.totalorder %s3823_s25, %s3823_s25 }
  0x1d   : > { %p3587_p9 = scmp.ne.s32.totalorder %s3823_s25, %s3586_s10  ;;  %p3595_p12 = scmp.lt.s32.totalorder %s3586_s10, %s3586_s10 }
  0x1f   : > { %p3589_p10 = pnand %p3587_p9, %p3575_p13  ;;  %p3596_p0 = por %p3595_p12, %p3594_p2 }
  0x21   : > { %p3590_p1 = pneg %p3589_p10 }
  0x23   : > { %p3597_p6 = pnand %p3596_p0, %p3590_p1 }
  0x25   : > { %3600 = shalt.err (!%p3597_p6)
}
  0x26   : > { %s3733_s11 = smov 64   ;;  %s3734_s12 = smov 4  }
  0x27   : > { %3435 = dma.hbm_to_vmem [thread:$0]  (!%p3830_p11), %s4459_s1, 256, %s3823_s25, [#allocation6], %s3733_s11, %s3733_s11, %s3734_s12  }
  0x28   : > { %s3601_s27 = scalar_lea.hbm %s4460_s2, 256 }
  0x29   : > { %p3602_p2 = scmp.ne.s32.totalorder %s4460_s2, %s3601_s27  ;;  %p3608_p10 = scmp.lt.u32.totalorder %s3601_s27, %s4460_s2 }
  0x2b   : > { %p3604_p1 = pnand %p3602_p2, %p3575_p13 }
  0x2d   : > { %p3605_p6 = pneg %p3604_p1 }
  0x2f   : > { %p3610_p3 = pnand %p3608_p10, %p3605_p6 }
  0x31   : > { %3613 = shalt.err (!%p3610_p3)
}
  0x32   : > { %s3614_s25 = scalar_lea.vmem %s3834_s28, 256  ;;  %p3622_p12 = scmp.lt.s32.totalorder %s3834_s28, %s3834_s28 }
  0x33   : > { %p3615_p5 = scmp.ne.s32.totalorder %s3834_s28, %s3614_s25  ;;  %p3623_p0 = scmp.lt.s32.totalorder %s3614_s25, %s3614_s25 }
  0x35   : > { %p3617_p7 = pnand %p3615_p5, %p3575_p13  ;;  %p3624_p2 = por %p3623_p0, %p3622_p12 }
  0x37   : > { %p3618_p9 = pneg %p3617_p7 }
  0x39   : > { %p3625_p1 = pnand %p3624_p2, %p3618_p9 }
  0x3b   : > { %3628 = shalt.err (!%p3625_p1)
}
  0x3c   : > { %3438 = dma.hbm_to_vmem [thread:$0]  (!%p3830_p11), %s4460_s2, 256, %s3834_s28, [#allocation6], %s3733_s11, %s3733_s11, %s3734_s12  }
  0x3d   : > { %s3889_s9 = sadd.s32 1, %s3729_s18   ;;  %s28_s26 = sadd.s32 1, %s3725_s17 }
  0x3e   : > { %s25_s10 = ssub.s32 %s3729_s18, %s3889_s9  ;;  %p35_p13 = scmp.ne.s32.totalorder %s3725_s17, %s3721_s16 }
  0x3f   : > { %p26_p6 = scmp.eq.s32.totalorder %s25_s10, 0  ;;  %p36_p10 = scmp.eq.s32.totalorder %s3729_s18, 0 }
  0x40   : > { %p4470_p3 = scmp.eq.s32.totalorder %s3800_s19, 1  ;;  %p3449_p7 = scmp.lt.s32.totalorder %s3729_s18, 2 }
  0x41   : > { %s3905_s14 = scalar_select %p26_p6, %s3725_s17, %s28_s26  }
  0x42   : > { %p3899_p5 = por %p4470_p3, %p35_p13  ;;  %p37_p9 = por %p36_p10, %p35_p13 }
  0x43   : > { %s183_s20 = sand.u32 1, %s3725_s17   ;;  %s3022_s28 = sshll.u32 %s3729_s18, 9 }
  0x44   : > { %s4471_s13 = scalar_select %p3899_p5, 1, 0 }
  0x45   : > { %s2956_s24 = sshll.u32 %s183_s20, 5  ;;  %s3912_s27 = scalar_lea.hbm %s4458_s0, %s3022_s28 }
  0x46   : > { %s187_s29 = scalar_lea.vmem [#allocation2], %s2956_s24  ;;  %p3916_p11 = pnand %p3449_p7, %p37_p9 }
  0x47   : > { %s194_s30 = sshll.u32 %s187_s29, 4  ;;  %s3920_s6 = scalar_lea.sflag [#allocation3], %s183_s20  ;;  %s3914_s30 = int_to_ptr.vmem [resolvable:$true] %s194_s30 }
  0x48   : > { %s3629_s25 = scalar_lea.hbm %s3912_s27, 512  ;;  %p3631_p0 = pneg %p3916_p11 }
  0x49   : > { %p3630_p12 = scmp.ne.s32.totalorder %s3912_s27, %s3629_s25  ;;  %s3634_s26 = scalar_lea.hbm %s4458_s0, 1024 }
  0x4a   : > { %p3635_p13 = scmp.lt.u32.totalorder %s3912_s27, %s4458_s0  ;;  %p3636_p6 = scmp.lt.u32.totalorder %s3634_s26, %s3629_s25 }
  0x4b   : > { %p3632_p2 = pnand %p3631_p0, %p3630_p12  ;;  %p3638_p3 = scmp.lt.u32.totalorder %s3629_s25, %s3912_s27 }
  0x4c   : > { %p3637_p10 = por %p3636_p6, %p3635_p13 }
  0x4d   : > { %p3633_p1 = pneg %p3632_p2 }
  0x4e   : > { %p3639_p7 = por %p3638_p3, %p3637_p10 }
  0x50   : > { %p3640_p9 = pnand %p3639_p7, %p3633_p1 }
  0x52   : > { %3643 = shalt.err (!%p3640_p9)
}
  0x53   : > { %s3644_s20 = scalar_lea.vmem %s3914_s30, 512  ;;  %s3735_s28 = smov [#allocation2]  }
  0x54   : > { %p3645_p12 = scmp.ne.s32.totalorder %s3914_s30, %s3644_s20  ;;  %s3649_s11 = sshll.u32 %s3735_s28, 4  ;;  %s3650_s11 = int_to_ptr.vmem [resolvable:$false] %s3649_s11 }
  0x55   : > { %s3651_s12 = scalar_lea.vmem %s3650_s11, 1024  ;;  %p3652_p4 = scmp.lt.s32.totalorder %s3914_s30, %s3650_s11 }
  0x56   : > { %p3647_p2 = pnand %p3645_p12, %p3631_p0  ;;  %p3653_p13 = scmp.lt.s32.totalorder %s3651_s12, %s3644_s20 }
  0x58   : > { %p3648_p5 = pneg %p3647_p2  ;;  %p3654_p6 = por %p3653_p13, %p3652_p4 }
  0x5a   : > { %p3655_p10 = pnand %p3654_p6, %p3648_p5 }
  0x5c   : > { %3658 = shalt.err (!%p3655_p10)
}
  0x5d   : > { %s3736_s29 = smov 128   ;;  %s3737_s25 = smov 8  }
  0x5e   : > { %3442 = dma.hbm_to_vmem [thread:$0]  (!%p3916_p11), %s3912_s27, 512, %s3914_s30, %s3920_s6, %s3736_s29, %s3736_s29, %s3737_s25  }
  0x5f   : > { %206 = sbr.rel (%p3819_p8) target bundleno = 8234 (0x202a), region = 36  ;;  %s3951_s7 = sand.u32 (!%p3819_p8), 1, %s3721_s16  }
  0x60   : > { %s2960_s8 = sshll.u32 (!%p3819_p8), %s3951_s7, 5  ;;  %s209_s26 = scalar_lea.sflag (!%p3819_p8), [#allocation3], %s3951_s7 }
  0x61   : > { %s212_s10 = scalar_lea.vmem (!%p3819_p8), [#allocation2], %s2960_s8  ;;  %p4473_p4 = scmp.ne.s32.totalorder (!%p3819_p8), %s4466_s21, 0 }
  0x66   : > { %3704 = dma.done.wait (%p4473_p4), %s209_s26, 512  }
  0x67   : > { %3706 = vsyncadd (%p4473_p4), %s209_s26, 4294966784  ;;  %p4474_p5 = scmp.eq.s32.totalorder %s3800_s19, 0 }
  0x69   : > { %3708 = dma.done.wait (%p4474_p5), [#allocation6], 512   ;;  %p4475_p8 = pmov %p4474_p5 }
  0x6a   : > { %v3506_v0 = vld [vmem:[#allocation5] sm:$0xff]   ;;  %v3507_v1 = vld [vmem:[#allocation5 + $0x8] sm:$0xff]   ;;  %vm273_vm0 = vcmask 261120   ;;  %v248_v5 = vld [vmem:[%s212_s10 + $0x10] sm:$0xff]  ;;  %v3738_v8 = vmov 0.0   ;;  %vm3739_vm1 = vmmov 0  }
  0x6b   : > { %3710 = vsyncadd (%p4475_p8), [#allocation6], 4294966784  ;;  %3124 = vmatprep.subr.bf16.mxu0 %v3506_v0  ;;  %v246_v2 = vld [vmem:[%s212_s10] sm:$0xff]  ;;  %v247_v3 = vld [vmem:[%s212_s10 + $0x8] sm:$0xff]  ;;  %3132 = vmatprep.subr.bf16.mxu1 %v3738_v8  ;;  %s3740_s21 = smov 120   ;;  %s3741_s23 = smov 96  }
  0x6c   : > { %3125 = vmatpush3.bf16.msra.mxu0 %v3506_v0  ;;  %v250_v4 = vpack.c.bf16 %v247_v3, %v246_v2  ;;  %v249_v6 = vld [vmem:[%s212_s10 + $0x18] sm:$0xff]  ;;  %3134 = vmatprep.mubr.msk.bf16.mxu1 %vm3739_vm1, %v3738_v8  ;;  %s3742_s27 = smov 88   ;;  %vm333_vm2 = vcmask 64512   ;;  %s3743_s30 = smov 64   ;;  %vm398_vm3 = vcmask 1043456  }
  0x6d   : > { %3126 = vmatprep.subr.bf16.mxu0 %v3507_v1  ;;  %v251_v7 = vpack.c.bf16 %v249_v6, %v248_v5  ;;  %s3744_s5 = smov 56   ;;  %s3745_s6 = smov 112   ;;  %v252_v53 = vld [vmem:[#allocation7] sm:$0xf]  ;;  %v253_v55 = vld [vmem:[#allocation7 + $0x4] sm:$0xf] }
  0x6e   : > { %3128 = vmatprep.mubr.msk.bf16.mxu0 %vm273_vm0, %v250_v4  ;;  %s3746_s24 = smov 80   ;;  %v4021_v54 = vsel %vm398_vm3, %v252_v53, 0  ;;  %v4025_v56 = vsel %vm398_vm3, %v253_v55, 0  ;;  %s3747_s20 = smov 72  }
  0x6f   : > { %s3748_s28 = smov 104   ;;  %s3749_s11 = smov 48  }
  0x70   : > { %3127 = vmatpush3.bf16.msra.mxu0 %v3507_v1  ;;  %s3750_s12 = smov 40   ;;  %s4135_s26 = scalar_lea.vmem [#allocation8], %s2960_s8 }
  0x71   : > { %3138 = vmatprep.subr.bf16.mxu0 %v3738_v8  ;;  %s2859_s8 = sshll.u32 %s4135_s26, 4  ;;  %s3023_s10 = sshll.u32 %s3800_s19, 9  ;;  %s4404_s8 = int_to_ptr.vmem [resolvable:$true] %s2859_s8 }
  0x72   : > { %s2846_s19 = scalar_lea.sflag [#allocation4], %s3951_s7  ;;  %p4476_p0 = scmp.ne.s32.totalorder %s4471_s13, 0 }
  0x73   : > { %3129 = vmatmul.mubr.msk.bf16.vlgmr.msra.gmra.mrb[0].mxu0 %vm273_vm0, %v251_v7 }
  0x74   : > { %3140 = vmatprep.mubr.msk.bf16.mxu0 %vm3739_vm1, %v3738_v8 }
 0x146   : > { %v3973_v9 = vpop.f32.mrb[0].mxu0 }
 0x147   : > { %v314_v10 = vpop.f32.mrb[1].mxu0 }
 0x148   : > { %v3975_v11 = vpack.c.bf16 %v314_v10, %v314_v10  ;;  %v3977_v12 = vpop.f32.mrb[2].mxu0 }
 0x149   : > { %v3979_v13 = vpop.f32.mrb[3].mxu0 }
 0x14a   : > { %443 = vrot.lane.b32.xlu1 %v3975_v11, %s3740_s21  ;;  %331 = vrot.lane.b32.xlu0 %v3975_v11, %s3741_s23  ;;  %v4074_v53 = vpack.c.bf16 %v3979_v13, %v3979_v13 }
 0x14e   : > { %445 = vrot.lane.b32.xlu0 %v3975_v11, %s3742_s27 }
 0x1bc   : > { %v332_v14 = vpop.permute.xlu0 %331  ;;  %v444_v18 = vpop.permute.xlu1 %443 }
 0x1bd   : > { %v338_v15 = vsel %vm333_vm2, %v332_v14, 0 }
 0x1be   : > { %3133 = vmatpush3.bf16.xpose.msra.mxu1 %v338_v15 }
 0x1bf   : > { %3144 = vmatprep.subr.bf16.mxu1 %v3738_v8 }
 0x1c0   : > { %v446_v16 = vpop.permute.xlu0 %445 }
 0x1c1   : > { %v451_v17 = vsel %vm333_vm2, %v446_v16, 0 }
 0x1c5   : > { %3135 = vmatmul.mubr.msk.bf16.vlgmr.msra.gmra.mrb[0].mxu1 %vm333_vm2, %v3975_v11 }
 0x1c6   : > { %3145 = vmatpush3.bf16.xpose.msra.mxu1 %v451_v17  ;;  %3146 = vmatprep.mubr.msk.bf16.mxu1 %vm3739_vm1, %v3738_v8 }
 0x1c7   : > { %3156 = vmatprep.subr.bf16.mxu1 %v3738_v8 }
 0x1cd   : > { %3147 = vmatmul.mubr.msk.bf16.vlgmr.msra.gmra.mrb[4].mxu1 %vm333_vm2, %v444_v18 }
 0x1ce   : > { %3158 = vmatprep.mubr.msk.bf16.mxu1 %vm3739_vm1, %v3738_v8  ;;  %3157 = vmatpush3.bf16.msra.mxu1 %v4025_v56 }
 0x1cf   : > { %3168 = vmatprep.subr.bf16.mxu1 %v3738_v8 }
 0x298   : > { %v374_v19 = vpop.f32.mrb[0].mxu1 }
 0x299   : > { %v380_v20 = vmul.f32 0.35355338, %v374_v19  ;;  %v3136_v21 = vpop.f32.mrb[1].mxu1 }
 0x29a   : > { %v377_v22 = vpop.f32.mrb[2].mxu1 }
 0x29b   : > { %v3137_v23 = vpop.f32.mrb[3].mxu1  ;;  %v381_v24 = vsel %vm333_vm2, %v380_v20, -inf }
 0x29c   : > { %382 = vmax.xlane.f32.xlu1 %v381_v24 }
 0x2a0   : > { %v487_v25 = vpop.f32.mrb[4].mxu1 }
 0x2a1   : > { %v493_v26 = vmul.f32 0.35355338, %v487_v25  ;;  %v3148_v27 = vpop.f32.mrb[5].mxu1 }
 0x2a2   : > { %v490_v28 = vpop.f32.mrb[6].mxu1 }
 0x2a3   : > { %v3149_v29 = vpop.f32.mrb[7].mxu1  ;;  %v494_v30 = vsel %vm333_vm2, %v493_v26, -inf }
 0x2a4   : > { %495 = vmax.xlane.f32.xlu0 %v494_v30 }
 0x329   : > { %v383_v31 = vpop.xlane.xlu1 %382 }
 0x32a   : > { %v384_v32 = vsub.f32 %v380_v20, %v383_v31 }
 0x32c   : > { %v385_v33 = vmul.f32 1.442695, %v384_v32 }
 0x32e   : > { %3508 = vpow2.f32 %v385_v33 }
 0x331   : > { %v496_v34 = vpop.xlane.xlu0 %495 }
 0x332   : > { %v497_v35 = vsub.f32 %v493_v26, %v496_v34 }
 0x334   : > { %v498_v36 = vmul.f32 1.442695, %v497_v35 }
 0x336   : > { %3510 = vpow2.f32 %v498_v36 }
 0x338   : > { %v3509_v37 = vpop.eup %3508 }
 0x339   : > { %v387_v38 = vsel %vm333_vm2, %v3509_v37, 0.0 }
 0x33a   : > { %388 = vadd.xlane.f32.xlu0 %v387_v38 }
 0x340   : > { %v3511_v39 = vpop.eup %3510 }
 0x341   : > { %v500_v40 = vsel %vm333_vm2, %v3511_v39, 0.0 }
 0x342   : > { %501 = vadd.xlane.f32.xlu1 %v500_v40  ;;  %v254_v40 = vld [vmem:[#allocation7 + $0x8] sm:$0xf] }
 0x350   : > { %393 = vrot.lane.b32.xlu0 %v3975_v11, %s3743_s30 }
 0x353   : > { %506 = vrot.lane.b32.xlu1 %v3975_v11, %s3744_s5 }
 0x354   : > { %647 = vrot.lane.b32.xlu0 %v3975_v11, %s3745_s6 }
 0x357   : > { %649 = vrot.lane.b32.xlu1 %v3975_v11, %s3746_s24 }
 0x3c7   : > { %v389_v41 = vpop.xlane.xlu0 %388 }
 0x3c8   : > { %3512 = vrcp.f32 %v389_v41  ;;  %v4062_v41 = vsel %vm398_vm3, %v254_v40, 0 }
 0x3cb   : > { %v394_v42 = vpop.permute.xlu0 %393 }
 0x3cc   : > { %v400_v43 = vsel %vm398_vm3, %v394_v42, 0 }
 0x3cd   : > { %3139 = vmatpush3.bf16.msra.mxu0 %v400_v43 }
 0x3ce   : > { %3150 = vmatprep.subr.bf16.mxu0 %v3738_v8 }
 0x3cf   : > { %v502_v44 = vpop.xlane.xlu1 %501  ;;  %v648_v5 = vpop.permute.xlu0 %647 }
 0x3d0   : > { %3514 = vrcp.f32 %v502_v44 }
 0x3d2   : > { %v3513_v45 = vpop.eup %3512 }
 0x3d3   : > { %v391_v46 = vmul.f32 %v3513_v45, %v3509_v37  ;;  %v507_v47 = vpop.permute.xlu1 %506 }
 0x3d4   : > { %v512_v49 = vsel %vm398_vm3, %v507_v47, 0 }
 0x3d5   : > { %v392_v48 = vpack.c.bf16 %v391_v46, %v391_v46 }
 0x3d7   : > { %3141 = vmatmul.mubr.msk.bf16.vlgmr.msra.gmra.mrb[4].mxu0 %vm333_vm2, %v392_v48  ;;  %v650_v62 = vpop.permute.xlu1 %649 }
 0x3d8   : > { %3151 = vmatpush3.bf16.msra.mxu0 %v512_v49  ;;  %3152 = vmatprep.mubr.msk.bf16.mxu0 %vm3739_vm1, %v3738_v8  ;;  %v655_v3 = vsel %vm333_vm2, %v650_v62, 0 }
 0x3d9   : > { %3162 = vmatprep.subr.bf16.mxu0 %v3738_v8 }
 0x3da   : > { %v3515_v50 = vpop.eup %3514 }
 0x3db   : > { %v504_v51 = vmul.f32 %v3515_v50, %v3511_v39 }
 0x3dd   : > { %v505_v52 = vpack.c.bf16 %v504_v51, %v504_v51 }
 0x3df   : > { %3153 = vmatmul.mubr.msk.bf16.vlgmr.msra.gmra.mrb[8].mxu0 %vm333_vm2, %v505_v52 }
 0x3e0   : > { %3164 = vmatprep.mubr.msk.bf16.mxu0 %vm3739_vm1, %v3738_v8  ;;  %3163 = vmatpush3.bf16.msra.mxu0 %v4021_v54 }
 0x3e1   : > { %3174 = vmatprep.subr.bf16.mxu0 %v3738_v8 }
 0x4aa   : > { %v436_v57 = vpop.f32.mrb[4].mxu0 }
 0x4ab   : > { %v442_v58 = vpack.c.bf16 %v436_v57, %v436_v57  ;;  %v3142_v59 = vpop.f32.mrb[5].mxu0 }
 0x4ac   : > { %v439_v60 = vpop.f32.mrb[6].mxu0 }
 0x4ad   : > { %v3143_v61 = vpop.f32.mrb[7].mxu0  ;;  %3165 = vmatmul.mubr.msk.bf16.vlgmr.msra.gmra.mrb[12].mxu0 %vm333_vm2, %v442_v58 }
 0x4ae   : > { %3176 = vmatprep.mubr.msk.bf16.mxu0 %vm3739_vm1, %v3738_v8 }
 0x4b2   : > { %v548_v63 = vpop.f32.mrb[8].mxu0 }
 0x4b3   : > { %v554_v0 = vpack.c.bf16 %v548_v63, %v548_v63  ;;  %v3154_v1 = vpop.f32.mrb[9].mxu0 }
 0x4b4   : > { %v551_v2 = vpop.f32.mrb[10].mxu0 }
 0x4b5   : > { %v3155_v4 = vpop.f32.mrb[11].mxu0  ;;  %3159 = vmatmul.mubr.msk.bf16.vlgmr.msra.gmra.mrb[8].mxu1 %vm333_vm2, %v554_v0 }
 0x4b6   : > { %3169 = vmatpush3.bf16.xpose.msra.mxu1 %v655_v3  ;;  %3170 = vmatprep.mubr.msk.bf16.mxu1 %vm3739_vm1, %v3738_v8 }
 0x4b7   : > { %3180 = vmatprep.subr.bf16.mxu1 %v3738_v8 }
 0x4bd   : > { %3171 = vmatmul.mubr.msk.bf16.vlgmr.msra.gmra.mrb[12].mxu1 %vm333_vm2, %v648_v5 }
 0x4be   : > { %3182 = vmatprep.mubr.msk.bf16.mxu1 %vm3739_vm1, %v3738_v8  ;;  %3181 = vmatpush3.bf16.msra.mxu1 %v4062_v41 }
 0x4bf   : > { %3192 = vmatprep.subr.bf16.mxu1 %v3738_v8 }
 0x580   : > { %v641_v6 = vpop.f32.mrb[12].mxu0 }
 0x581   : > { %v3166_v7 = vpop.f32.mrb[13].mxu0 }
 0x582   : > { %v644_v10 = vpop.f32.mrb[14].mxu0 }
 0x583   : > { %v3167_v14 = vpop.f32.mrb[15].mxu0 }
 0x588   : > { %v595_v15 = vpop.f32.mrb[8].mxu1 }
 0x589   : > { %v4041_v16 = vadd.f32 %v641_v6, %v595_v15  ;;  %v3160_v17 = vpop.f32.mrb[9].mxu1 }
 0x58a   : > { %v598_v18 = vpop.f32.mrb[10].mxu1 }
 0x58b   : > { %v3161_v19 = vpop.f32.mrb[11].mxu1 }
 0x590   : > { %v691_v20 = vpop.f32.mrb[12].mxu1 }
 0x591   : > { %v697_v21 = vmul.f32 0.35355338, %v691_v20  ;;  %v3172_v22 = vpop.f32.mrb[13].mxu1 }
 0x592   : > { %v694_v23 = vpop.f32.mrb[14].mxu1 }
 0x593   : > { %v3173_v24 = vpop.f32.mrb[15].mxu1  ;;  %v698_v25 = vsel %vm333_vm2, %v697_v21, -inf }
 0x594   : > { %699 = vmax.xlane.f32.xlu1 %v698_v25 }
 0x5a5   : > { %808 = vrot.lane.b32.xlu1 %v3975_v11, %s3747_s20 }
 0x5a9   : > { %806 = vrot.lane.b32.xlu1 %v3975_v11, %s3748_s28 }
 0x621   : > { %v700_v26 = vpop.xlane.xlu1 %699 }
 0x622   : > { %v701_v27 = vsub.f32 %v697_v21, %v700_v26 }
 0x624   : > { %v702_v28 = vmul.f32 1.442695, %v701_v27 }
 0x625   : > { %v809_v36 = vpop.permute.xlu1 %808 }
 0x626   : > { %3516 = vpow2.f32 %v702_v28  ;;  %v814_v38 = vsel %vm333_vm2, %v809_v36, 0 }
 0x629   : > { %v807_v39 = vpop.permute.xlu1 %806 }
 0x630   : > { %v3517_v29 = vpop.eup %3516 }
 0x631   : > { %v704_v30 = vsel %vm333_vm2, %v3517_v29, 0.0 }
 0x632   : > { %705 = vadd.xlane.f32.xlu0 %v704_v30 }
 0x648   : > { %710 = vrot.lane.b32.xlu0 %v3975_v11, %s3749_s11 }
 0x6bf   : > { %v706_v31 = vpop.xlane.xlu0 %705 }
 0x6c0   : > { %3518 = vrcp.f32 %v706_v31 }
 0x6c3   : > { %v711_v32 = vpop.permute.xlu0 %710 }
 0x6c4   : > { %v716_v33 = vsel %vm398_vm3, %v711_v32, 0 }
 0x6c5   : > { %3175 = vmatpush3.bf16.msra.mxu0 %v716_v33 }
 0x6c6   : > { %3186 = vmatprep.subr.bf16.mxu0 %v3738_v8 }
 0x6ca   : > { %v3519_v34 = vpop.eup %3518 }
 0x6cb   : > { %v708_v35 = vmul.f32 %v3519_v34, %v3517_v29 }
 0x6cd   : > { %v709_v37 = vpack.c.bf16 %v708_v35, %v708_v35 }
 0x6cf   : > { %3177 = vmatmul.mubr.msk.bf16.vlgmr.msra.gmra.mrb[16].mxu0 %vm333_vm2, %v709_v37 }
 0x6d0   : > { %3187 = vmatpush3.bf16.xpose.msra.mxu0 %v814_v38  ;;  %3188 = vmatprep.mubr.msk.bf16.mxu0 %vm3739_vm1, %v3738_v8 }
 0x6d1   : > { %3198 = vmatprep.subr.bf16.mxu0 %v3738_v8 }
 0x6d7   : > { %3189 = vmatmul.mubr.msk.bf16.vlgmr.msra.gmra.mrb[20].mxu0 %vm333_vm2, %v807_v39 }
 0x6d8   : > { %3200 = vmatprep.mubr.msk.bf16.mxu0 %vm3739_vm1, %v3738_v8 }
 0x7a2   : > { %v752_v42 = vpop.f32.mrb[16].mxu0 }
 0x7a3   : > { %v758_v43 = vpack.c.bf16 %v752_v42, %v752_v42  ;;  %v3178_v44 = vpop.f32.mrb[17].mxu0 }
 0x7a4   : > { %v755_v45 = vpop.f32.mrb[18].mxu0 }
 0x7a5   : > { %v3179_v46 = vpop.f32.mrb[19].mxu0  ;;  %3183 = vmatmul.mubr.msk.bf16.vlgmr.msra.gmra.mrb[16].mxu1 %vm333_vm2, %v758_v43 }
 0x7a6   : > { %3194 = vmatprep.mubr.msk.bf16.mxu1 %vm3739_vm1, %v3738_v8 }
 0x7aa   : > { %v850_v47 = vpop.f32.mrb[20].mxu0 }
 0x7ab   : > { %v856_v48 = vmul.f32 0.35355338, %v850_v47  ;;  %v3190_v49 = vpop.f32.mrb[21].mxu0 }
 0x7ac   : > { %v853_v50 = vpop.f32.mrb[22].mxu0 }
 0x7ad   : > { %v3191_v51 = vpop.f32.mrb[23].mxu0  ;;  %v857_v52 = vsel %vm333_vm2, %v856_v48, -inf }
 0x7ae   : > { %858 = vmax.xlane.f32.xlu0 %v857_v52 }
 0x7c4   : > { %869 = vrot.lane.b32.xlu0 %v3975_v11, %s3750_s12 }
 0x7c8   : > { %1087 = vrot.lane.b32.xlu0 %v4074_v53, %s3742_s27 }
 0x83b   : > { %v859_v55 = vpop.xlane.xlu0 %858 }
 0x83c   : > { %v860_v57 = vsub.f32 %v856_v48, %v859_v55  ;;  %v4129_v48 = vld [vmem:[%s4461_s3] ss:$0 sm:$0xff] }
 0x83e   : > { %v861_v58 = vmul.f32 1.442695, %v860_v57 }
 0x83f   : > { %v870_v59 = vpop.permute.xlu0 %869 }
 0x840   : > { %3520 = vpow2.f32 %v861_v58  ;;  %v875_v60 = vsel %vm398_vm3, %v870_v59, 0 }
 0x841   : > { %3193 = vmatpush3.bf16.msra.mxu1 %v875_v60 }
 0x842   : > { %3204 = vmatprep.subr.bf16.mxu1 %v3738_v8 }
 0x843   : > { %v1088_v10 = vpop.permute.xlu0 %1087 }
 0x844   : > { %v1093_v14 = vsel %vm333_vm2, %v1088_v10, 0 }
 0x84a   : > { %v3521_v61 = vpop.eup %3520 }
 0x84b   : > { %v863_v11 = vsel %vm333_vm2, %v3521_v61, 0.0 }
 0x84c   : > { %864 = vadd.xlane.f32.xlu1 %v863_v11 }
 0x85d   : > { %975 = vrot.lane.b32.xlu1 %v4074_v53, %s3741_s23 }
 0x861   : > { %1085 = vrot.lane.b32.xlu1 %v4074_v53, %s3740_s21 }
 0x878   : > { %v799_v13 = vpop.f32.mrb[16].mxu1 }
 0x879   : > { %v4086_v62 = vadd.f32 %v799_v13, %v4041_v16  ;;  %v3184_v63 = vpop.f32.mrb[17].mxu1  ;;  %v255_v16 = vld [vmem:[#allocation7 + $0xc] sm:$0xf] }
 0x87a   : > { %v802_v0 = vpop.f32.mrb[18].mxu1  ;;  %v4105_v17 = vsel %vm398_vm3, %v255_v16, 0 }
 0x87b   : > { %v3185_v1 = vpop.f32.mrb[19].mxu1  ;;  %3199 = vmatpush3.bf16.msra.mxu0 %v4105_v17 }
 0x87c   : > { %3210 = vmatprep.subr.bf16.mxu0 %v3738_v8 }
 0x8d9   : > { %v865_v2 = vpop.xlane.xlu1 %864 }
 0x8da   : > { %3522 = vrcp.f32 %v865_v2 }
 0x8dd   : > { %v976_v5 = vpop.permute.xlu1 %975 }
 0x8de   : > { %v981_v7 = vsel %vm333_vm2, %v976_v5, 0 }
 0x8e1   : > { %v1086_v15 = vpop.permute.xlu1 %1085 }
 0x8e4   : > { %v3523_v3 = vpop.eup %3522 }
 0x8e5   : > { %v867_v4 = vmul.f32 %v3523_v3, %v3521_v61 }
 0x8e7   : > { %v868_v6 = vpack.c.bf16 %v867_v4, %v867_v4 }
 0x8e9   : > { %3195 = vmatmul.mubr.msk.bf16.vlgmr.msra.gmra.mrb[20].mxu1 %vm333_vm2, %v868_v6 }
 0x8ea   : > { %3205 = vmatpush3.bf16.xpose.msra.mxu1 %v981_v7  ;;  %3206 = vmatprep.mubr.msk.bf16.mxu1 %vm3739_vm1, %v3738_v8 }
 0x8eb   : > { %3216 = vmatprep.subr.bf16.mxu1 %v3738_v8 }
 0x8f1   : > { %3207 = vmatmul.mubr.msk.bf16.vlgmr.msra.gmra.mrb[24].mxu1 %vm333_vm2, %v4074_v53 }
 0x8f2   : > { %3217 = vmatpush3.bf16.xpose.msra.mxu1 %v1093_v14  ;;  %3218 = vmatprep.mubr.msk.bf16.mxu1 %vm3739_vm1, %v3738_v8 }
 0x8f3   : > { %3228 = vmatprep.subr.bf16.mxu1 %v3738_v8 }
 0x8f9   : > { %3219 = vmatmul.mubr.msk.bf16.vlgmr.msra.gmra.mrb[28].mxu1 %vm333_vm2, %v1086_v15 }
 0x8fa   : > { %3229 = vmatpush3.bf16.msra.mxu1 %v4025_v56  ;;  %3230 = vmatprep.mubr.msk.bf16.mxu1 %vm3739_vm1, %v3738_v8 }
 0x8fb   : > { %3240 = vmatprep.subr.bf16.mxu1 %v3738_v8 }
 0x9bc   : > { %v911_v18 = vpop.f32.mrb[20].mxu1 }
 0x9bd   : > { %v917_v19 = vpack.c.bf16 %v911_v18, %v911_v18  ;;  %v3196_v20 = vpop.f32.mrb[21].mxu1 }
 0x9be   : > { %v914_v21 = vpop.f32.mrb[22].mxu1 }
 0x9bf   : > { %v3197_v22 = vpop.f32.mrb[23].mxu1  ;;  %3201 = vmatmul.mubr.msk.bf16.vlgmr.msra.gmra.mrb[24].mxu0 %vm333_vm2, %v917_v19 }
 0x9c0   : > { %3212 = vmatprep.mubr.msk.bf16.mxu0 %vm3739_vm1, %v3738_v8 }
 0x9c4   : > { %v1017_v23 = vpop.f32.mrb[24].mxu1 }
 0x9c5   : > { %v1023_v24 = vmul.f32 0.35355338, %v1017_v23  ;;  %v3208_v25 = vpop.f32.mrb[25].mxu1 }
 0x9c6   : > { %v1020_v26 = vpop.f32.mrb[26].mxu1 }
 0x9c7   : > { %v3209_v27 = vpop.f32.mrb[27].mxu1  ;;  %v1024_v28 = vsel %vm333_vm2, %v1023_v24, -inf }
 0x9c8   : > { %1025 = vmax.xlane.f32.xlu0 %v1024_v28 }
 0x9cc   : > { %v1129_v29 = vpop.f32.mrb[28].mxu1 }
 0x9cd   : > { %v1135_v30 = vmul.f32 0.35355338, %v1129_v29  ;;  %v3220_v31 = vpop.f32.mrb[29].mxu1 }
 0x9ce   : > { %v1132_v32 = vpop.f32.mrb[30].mxu1 }
 0x9cf   : > { %v3221_v33 = vpop.f32.mrb[31].mxu1  ;;  %v1136_v34 = vsel %vm333_vm2, %v1135_v30, -inf }
 0x9d0   : > { %1137 = vmax.xlane.f32.xlu1 %v1136_v34 }
 0x9e1   : > { %1036 = vrot.lane.b32.xlu1 %v4074_v53, %s3743_s30 }
 0x9e5   : > { %1285 = vrot.lane.b32.xlu1 %v4074_v53, %s3746_s24 }
 0x9e9   : > { %1283 = vrot.lane.b32.xlu1 %v4074_v53, %s3745_s6 }
 0xa55   : > { %v1026_v35 = vpop.xlane.xlu0 %1025 }
 0xa56   : > { %v1027_v36 = vsub.f32 %v1023_v24, %v1026_v35 }
 0xa58   : > { %v1028_v37 = vmul.f32 1.442695, %v1027_v36 }
 0xa5a   : > { %3524 = vpow2.f32 %v1028_v37 }
 0xa5d   : > { %v1138_v38 = vpop.xlane.xlu1 %1137 }
 0xa5e   : > { %v1139_v39 = vsub.f32 %v1135_v30, %v1138_v38 }
 0xa60   : > { %v1140_v40 = vmul.f32 1.442695, %v1139_v39 }
 0xa61   : > { %v1037_v42 = vpop.permute.xlu1 %1036 }
 0xa62   : > { %3526 = vpow2.f32 %v1140_v40  ;;  %v1042_v43 = vsel %vm398_vm3, %v1037_v42, 0 }
 0xa63   : > { %3211 = vmatpush3.bf16.msra.mxu0 %v1042_v43 }
 0xa64   : > { %v3525_v44 = vpop.eup %3524  ;;  %3222 = vmatprep.subr.bf16.mxu0 %v3738_v8 }
 0xa65   : > { %v1030_v45 = vsel %vm333_vm2, %v3525_v44, 0.0  ;;  %v1286_v7 = vpop.permute.xlu1 %1285 }
 0xa66   : > { %1031 = vadd.xlane.f32.xlu0 %v1030_v45  ;;  %v1291_v18 = vsel %vm333_vm2, %v1286_v7, 0 }
 0xa69   : > { %v1284_v20 = vpop.permute.xlu1 %1283 }
 0xa6c   : > { %v3527_v46 = vpop.eup %3526 }
 0xa6d   : > { %v1142_v47 = vsel %vm333_vm2, %v3527_v46, 0.0 }
 0xa6e   : > { %1143 = vadd.xlane.f32.xlu0 %v1142_v47 }
 0xa84   : > { %1148 = vrot.lane.b32.xlu0 %v4074_v53, %s3744_s5 }
 0xa92   : > { %v958_v49 = vpop.f32.mrb[24].mxu0 }
 0xa93   : > { %v964_v50 = vadd.f32 %v958_v49, %v4086_v62  ;;  %v3202_v51 = vpop.f32.mrb[25].mxu0 }
 0xa94   : > { %v961_v52 = vpop.f32.mrb[26].mxu0 }
 0xa95   : > { %v971_v55 = vadd.f32 %v4129_v48, %v964_v50  ;;  %v3203_v57 = vpop.f32.mrb[27].mxu0 }
 0xa97   : > { %972 = vst.msk [vmem:[%s4135_s26] sm:$0xff] %vm273_vm0, %v971_v55 }
 0xaf3   : > { %v1032_v58 = vpop.xlane.xlu0 %1031 }
 0xaf4   : > { %3528 = vrcp.f32 %v1032_v58 }
 0xafb   : > { %v1144_v59 = vpop.xlane.xlu0 %1143 }
 0xafc   : > { %3530 = vrcp.f32 %v1144_v59 }
 0xafe   : > { %v3529_v60 = vpop.eup %3528 }
 0xaff   : > { %v1034_v61 = vmul.f32 %v3529_v60, %v3525_v44  ;;  %v1149_v11 = vpop.permute.xlu0 %1148 }
 0xb00   : > { %v1154_v62 = vsel %vm398_vm3, %v1149_v11, 0 }
 0xb01   : > { %v1035_v13 = vpack.c.bf16 %v1034_v61, %v1034_v61 }
 0xb03   : > { %3213 = vmatmul.mubr.msk.bf16.vlgmr.msra.gmra.mrb[28].mxu0 %vm333_vm2, %v1035_v13 }
 0xb04   : > { %3223 = vmatpush3.bf16.msra.mxu0 %v1154_v62  ;;  %3224 = vmatprep.mubr.msk.bf16.mxu0 %vm3739_vm1, %v3738_v8 }
 0xb05   : > { %3234 = vmatprep.subr.bf16.mxu0 %v3738_v8 }
 0xb06   : > { %v3531_v63 = vpop.eup %3530 }
 0xb07   : > { %v1146_v0 = vmul.f32 %v3531_v63, %v3527_v46 }
 0xb09   : > { %v1147_v1 = vpack.c.bf16 %v1146_v0, %v1146_v0  ;;  %v4190_v0 = vpack.c.bf16 %v3973_v9, %v3973_v9 }
 0xb0b   : > { %3225 = vmatmul.mubr.msk.bf16.vlgmr.msra.gmra.mrb[32].mxu0 %vm333_vm2, %v1147_v1 }
 0xb0c   : > { %3235 = vmatpush3.bf16.msra.mxu0 %v4021_v54  ;;  %3236 = vmatprep.mubr.msk.bf16.mxu0 %vm3739_vm1, %v3738_v8 }
 0xb0d   : > { %3246 = vmatprep.subr.bf16.mxu0 %v3738_v8 }
 0xbd6   : > { %v1078_v2 = vpop.f32.mrb[28].mxu0 }
 0xbd7   : > { %v1084_v3 = vpack.c.bf16 %v1078_v2, %v1078_v2  ;;  %v3214_v4 = vpop.f32.mrb[29].mxu0 }
 0xbd8   : > { %v1081_v5 = vpop.f32.mrb[30].mxu0 }
 0xbd9   : > { %v3215_v6 = vpop.f32.mrb[31].mxu0  ;;  %3237 = vmatmul.mubr.msk.bf16.vlgmr.msra.gmra.mrb[36].mxu0 %vm333_vm2, %v1084_v3 }
 0xbda   : > { %3248 = vmatprep.mubr.msk.bf16.mxu0 %vm3739_vm1, %v3738_v8 }
 0xbde   : > { %v1190_v10 = vpop.f32.mrb[32].mxu0 }
 0xbdf   : > { %v1196_v14 = vpack.c.bf16 %v1190_v10, %v1190_v10  ;;  %v3226_v15 = vpop.f32.mrb[33].mxu0 }
 0xbe0   : > { %v1193_v16 = vpop.f32.mrb[34].mxu0 }
 0xbe1   : > { %v3227_v19 = vpop.f32.mrb[35].mxu0  ;;  %3231 = vmatmul.mubr.msk.bf16.vlgmr.msra.gmra.mrb[32].mxu1 %vm333_vm2, %v1196_v14 }
 0xbe2   : > { %3241 = vmatpush3.bf16.xpose.msra.mxu1 %v1291_v18  ;;  %3242 = vmatprep.mubr.msk.bf16.mxu1 %vm3739_vm1, %v3738_v8 }
 0xbe3   : > { %3252 = vmatprep.subr.bf16.mxu1 %v3738_v8 }
 0xbe9   : > { %3243 = vmatmul.mubr.msk.bf16.vlgmr.msra.gmra.mrb[36].mxu1 %vm333_vm2, %v1284_v20 }
 0xbea   : > { %3253 = vmatpush3.bf16.msra.mxu1 %v4062_v41  ;;  %3254 = vmatprep.mubr.msk.bf16.mxu1 %vm3739_vm1, %v3738_v8 }
 0xbeb   : > { %3264 = vmatprep.subr.bf16.mxu1 %v3738_v8 }
 0xcac   : > { %v1277_v21 = vpop.f32.mrb[36].mxu0 }
 0xcad   : > { %v3238_v22 = vpop.f32.mrb[37].mxu0 }
 0xcae   : > { %v1280_v23 = vpop.f32.mrb[38].mxu0 }
 0xcaf   : > { %v3239_v24 = vpop.f32.mrb[39].mxu0 }
 0xcb4   : > { %v1234_v25 = vpop.f32.mrb[32].mxu1 }
 0xcb5   : > { %v4162_v26 = vadd.f32 %v1277_v21, %v1234_v25  ;;  %v3232_v27 = vpop.f32.mrb[33].mxu1 }
 0xcb6   : > { %v1237_v28 = vpop.f32.mrb[34].mxu1 }
 0xcb7   : > { %v3233_v29 = vpop.f32.mrb[35].mxu1 }
 0xcbc   : > { %v1327_v30 = vpop.f32.mrb[36].mxu1 }
 0xcbd   : > { %v1333_v31 = vmul.f32 0.35355338, %v1327_v30  ;;  %v3244_v32 = vpop.f32.mrb[37].mxu1 }
 0xcbe   : > { %v1330_v33 = vpop.f32.mrb[38].mxu1 }
 0xcbf   : > { %v3245_v34 = vpop.f32.mrb[39].mxu1  ;;  %v1334_v35 = vsel %vm333_vm2, %v1333_v31, -inf }
 0xcc0   : > { %1335 = vmax.xlane.f32.xlu0 %v1334_v35 }
 0xcd6   : > { %1346 = vrot.lane.b32.xlu0 %v4074_v53, %s3749_s11 }
 0xcda   : > { %1439 = vrot.lane.b32.xlu0 %v4074_v53, %s3748_s28 }
 0xd4d   : > { %v1336_v36 = vpop.xlane.xlu0 %1335 }
 0xd4e   : > { %v1337_v37 = vsub.f32 %v1333_v31, %v1336_v36 }
 0xd50   : > { %v1338_v38 = vmul.f32 1.442695, %v1337_v37 }
 0xd51   : > { %v1347_v39 = vpop.permute.xlu0 %1346 }
 0xd52   : > { %3532 = vpow2.f32 %v1338_v38  ;;  %v1352_v40 = vsel %vm398_vm3, %v1347_v39, 0 }
 0xd53   : > { %3247 = vmatpush3.bf16.msra.mxu0 %v1352_v40 }
 0xd54   : > { %3258 = vmatprep.subr.bf16.mxu0 %v3738_v8 }
 0xd55   : > { %v1440_v51 = vpop.permute.xlu0 %1439 }
 0xd5c   : > { %v3533_v42 = vpop.eup %3532 }
 0xd5d   : > { %v1340_v43 = vsel %vm333_vm2, %v3533_v42, 0.0 }
 0xd5e   : > { %1341 = vadd.xlane.f32.xlu1 %v1340_v43 }
 0xd6f   : > { %1441 = vrot.lane.b32.xlu1 %v4074_v53, %s3747_s20 }
 0xdeb   : > { %v1342_v44 = vpop.xlane.xlu1 %1341 }
 0xdec   : > { %3534 = vrcp.f32 %v1342_v44 }
 0xdef   : > { %v1442_v47 = vpop.permute.xlu1 %1441 }
 0xdf0   : > { %v1447_v50 = vsel %vm333_vm2, %v1442_v47, 0 }
 0xdf6   : > { %v3535_v45 = vpop.eup %3534 }
 0xdf7   : > { %v1344_v46 = vmul.f32 %v3535_v45, %v3533_v42 }
 0xdf9   : > { %v1345_v49 = vpack.c.bf16 %v1344_v46, %v1344_v46 }
 0xdfb   : > { %3249 = vmatmul.mubr.msk.bf16.vlgmr.msra.gmra.mrb[40].mxu0 %vm333_vm2, %v1345_v49 }
 0xdfc   : > { %3259 = vmatpush3.bf16.xpose.msra.mxu0 %v1447_v50  ;;  %3260 = vmatprep.mubr.msk.bf16.mxu0 %vm3739_vm1, %v3738_v8 }
 0xdfd   : > { %3270 = vmatprep.subr.bf16.mxu0 %v3738_v8 }
 0xe03   : > { %3261 = vmatmul.mubr.msk.bf16.vlgmr.msra.gmra.mrb[44].mxu0 %vm333_vm2, %v1440_v51 }
 0xe04   : > { %3271 = vmatpush3.bf16.msra.mxu0 %v4105_v17  ;;  %3272 = vmatprep.mubr.msk.bf16.mxu0 %vm3739_vm1, %v3738_v8 }
 0xe05   : > { %3282 = vmatprep.subr.bf16.mxu0 %v3738_v8 }
 0xece   : > { %v1388_v52 = vpop.f32.mrb[40].mxu0 }
 0xecf   : > { %v1394_v55 = vpack.c.bf16 %v1388_v52, %v1388_v52  ;;  %v3250_v57 = vpop.f32.mrb[41].mxu0 }
 0xed0   : > { %v1391_v58 = vpop.f32.mrb[42].mxu0 }
 0xed1   : > { %v3251_v59 = vpop.f32.mrb[43].mxu0  ;;  %3255 = vmatmul.mubr.msk.bf16.vlgmr.msra.gmra.mrb[40].mxu1 %vm333_vm2, %v1394_v55 }
 0xed2   : > { %3266 = vmatprep.mubr.msk.bf16.mxu1 %vm3739_vm1, %v3738_v8 }
 0xed6   : > { %v1483_v60 = vpop.f32.mrb[44].mxu0 }
 0xed7   : > { %v1489_v61 = vmul.f32 0.35355338, %v1483_v60  ;;  %v3262_v11 = vpop.f32.mrb[45].mxu0 }
 0xed8   : > { %v1486_v13 = vpop.f32.mrb[46].mxu0 }
 0xed9   : > { %v3263_v62 = vpop.f32.mrb[47].mxu0  ;;  %v1490_v63 = vsel %vm333_vm2, %v1489_v61, -inf }
 0xeda   : > { %1491 = vmax.xlane.f32.xlu1 %v1490_v63 }
 0xeeb   : > { %1599 = vrot.lane.b32.xlu1 %v4190_v0, %s3741_s23 }
 0xeef   : > { %1711 = vrot.lane.b32.xlu1 %v4190_v0, %s3742_s27 }
 0xf67   : > { %v1492_v1 = vpop.xlane.xlu1 %1491 }
 0xf68   : > { %v1493_v2 = vsub.f32 %v1489_v61, %v1492_v1 }
 0xf6a   : > { %v1494_v3 = vmul.f32 1.442695, %v1493_v2 }
 0xf6b   : > { %v1600_v20 = vpop.permute.xlu1 %1599 }
 0xf6c   : > { %3536 = vpow2.f32 %v1494_v3  ;;  %v1605_v22 = vsel %vm333_vm2, %v1600_v20, 0 }
 0xf6f   : > { %v1712_v23 = vpop.permute.xlu1 %1711 }
 0xf70   : > { %v1717_v24 = vsel %vm333_vm2, %v1712_v23, 0 }
 0xf76   : > { %v3537_v4 = vpop.eup %3536 }
 0xf77   : > { %v1496_v5 = vsel %vm333_vm2, %v3537_v4, 0.0 }
 0xf78   : > { %1497 = vadd.xlane.f32.xlu0 %v1496_v5 }
 0xf8e   : > { %1502 = vrot.lane.b32.xlu0 %v4074_v53, %s3750_s12 }
 0xf92   : > { %1709 = vrot.lane.b32.xlu0 %v4190_v0, %s3740_s21 }
 0xfa4   : > { %v1432_v9 = vpop.f32.mrb[40].mxu1 }
 0xfa5   : > { %v4202_v6 = vadd.f32 %v1432_v9, %v4162_v26  ;;  %v3256_v7 = vpop.f32.mrb[41].mxu1 }
 0xfa6   : > { %v1435_v10 = vpop.f32.mrb[42].mxu1 }
 0xfa7   : > { %v3257_v14 = vpop.f32.mrb[43].mxu1 }
0x1005   : > { %v1498_v15 = vpop.xlane.xlu0 %1497 }
0x1006   : > { %3538 = vrcp.f32 %v1498_v15 }
0x1009   : > { %v1503_v16 = vpop.permute.xlu0 %1502 }
0x100a   : > { %v1508_v18 = vsel %vm398_vm3, %v1503_v16, 0 }
0x100b   : > { %3265 = vmatpush3.bf16.msra.mxu1 %v1508_v18 }
0x100c   : > { %3276 = vmatprep.subr.bf16.mxu1 %v3738_v8 }
0x100d   : > { %v1710_v25 = vpop.permute.xlu0 %1709 }
0x1010   : > { %v3539_v19 = vpop.eup %3538 }
0x1011   : > { %v1500_v53 = vmul.f32 %v3539_v19, %v3537_v4 }
0x1013   : > { %v1501_v21 = vpack.c.bf16 %v1500_v53, %v1500_v53 }
0x1015   : > { %3267 = vmatmul.mubr.msk.bf16.vlgmr.msra.gmra.mrb[44].mxu1 %vm333_vm2, %v1501_v21 }
0x1016   : > { %3277 = vmatpush3.bf16.xpose.msra.mxu1 %v1605_v22  ;;  %3278 = vmatprep.mubr.msk.bf16.mxu1 %vm3739_vm1, %v3738_v8 }
0x1017   : > { %3288 = vmatprep.subr.bf16.mxu1 %v3738_v8 }
0x101d   : > { %3279 = vmatmul.mubr.msk.bf16.vlgmr.msra.gmra.mrb[48].mxu1 %vm333_vm2, %v4190_v0 }
0x101e   : > { %3289 = vmatpush3.bf16.xpose.msra.mxu1 %v1717_v24  ;;  %3290 = vmatprep.mubr.msk.bf16.mxu1 %vm3739_vm1, %v3738_v8 }
0x101f   : > { %3300 = vmatprep.subr.bf16.mxu1 %v3738_v8 }
0x1025   : > { %3291 = vmatmul.mubr.msk.bf16.vlgmr.msra.gmra.mrb[52].mxu1 %vm333_vm2, %v1710_v25 }
0x1026   : > { %3301 = vmatpush3.bf16.msra.mxu1 %v4025_v56  ;;  %3302 = vmatprep.mubr.msk.bf16.mxu1 %vm3739_vm1, %v3738_v8 }
0x1027   : > { %3312 = vmatprep.subr.bf16.mxu1 %v3738_v8 }
0x10e8   : > { %v1544_v26 = vpop.f32.mrb[44].mxu1 }
0x10e9   : > { %v1550_v27 = vpack.c.bf16 %v1544_v26, %v1544_v26  ;;  %v3268_v28 = vpop.f32.mrb[45].mxu1 }
0x10ea   : > { %v1547_v29 = vpop.f32.mrb[46].mxu1 }
0x10eb   : > { %v3269_v30 = vpop.f32.mrb[47].mxu1  ;;  %3273 = vmatmul.mubr.msk.bf16.vlgmr.msra.gmra.mrb[48].mxu0 %vm333_vm2, %v1550_v27 }
0x10ec   : > { %3284 = vmatprep.mubr.msk.bf16.mxu0 %vm3739_vm1, %v3738_v8 }
0x10f0   : > { %v1641_v31 = vpop.f32.mrb[48].mxu1 }
0x10f1   : > { %v1647_v32 = vmul.f32 0.35355338, %v1641_v31  ;;  %v3280_v33 = vpop.f32.mrb[49].mxu1 }
0x10f2   : > { %v1644_v34 = vpop.f32.mrb[50].mxu1 }
0x10f3   : > { %v3281_v35 = vpop.f32.mrb[51].mxu1  ;;  %v1648_v36 = vsel %vm333_vm2, %v1647_v32, -inf }
0x10f4   : > { %1649 = vmax.xlane.f32.xlu1 %v1648_v36 }
0x10f8   : > { %v1753_v37 = vpop.f32.mrb[52].mxu1 }
0x10f9   : > { %v1759_v38 = vmul.f32 0.35355338, %v1753_v37  ;;  %v3292_v39 = vpop.f32.mrb[53].mxu1 }
0x10fa   : > { %v1756_v40 = vpop.f32.mrb[54].mxu1 }
0x10fb   : > { %v3293_v42 = vpop.f32.mrb[55].mxu1  ;;  %v1760_v43 = vsel %vm333_vm2, %v1759_v38, -inf }
0x10fc   : > { %1761 = vmax.xlane.f32.xlu0 %v1760_v43 }
0x1181   : > { %v1650_v44 = vpop.xlane.xlu1 %1649 }
0x1182   : > { %v1651_v45 = vsub.f32 %v1647_v32, %v1650_v44 }
0x1184   : > { %v1652_v46 = vmul.f32 1.442695, %v1651_v45 }
0x1186   : > { %3540 = vpow2.f32 %v1652_v46 }
0x1189   : > { %v1762_v47 = vpop.xlane.xlu0 %1761 }
0x118a   : > { %v1763_v49 = vsub.f32 %v1759_v38, %v1762_v47 }
0x118c   : > { %v1764_v50 = vmul.f32 1.442695, %v1763_v49 }
0x118e   : > { %3542 = vpow2.f32 %v1764_v50 }
0x1190   : > { %v3541_v51 = vpop.eup %3540 }
0x1191   : > { %v1654_v52 = vsel %vm333_vm2, %v3541_v51, 0.0 }
0x1192   : > { %1655 = vadd.xlane.f32.xlu0 %v1654_v52 }
0x1198   : > { %v3543_v55 = vpop.eup %3542 }
0x1199   : > { %v1766_v57 = vsel %vm333_vm2, %v3543_v55, 0.0 }
0x119a   : > { %1767 = vadd.xlane.f32.xlu1 %v1766_v57 }
0x11a8   : > { %1660 = vrot.lane.b32.xlu0 %v4190_v0, %s3743_s30 }
0x11ab   : > { %1772 = vrot.lane.b32.xlu1 %v4190_v0, %s3744_s5 }
0x11ac   : > { %1907 = vrot.lane.b32.xlu0 %v4190_v0, %s3745_s6 }
0x11af   : > { %1909 = vrot.lane.b32.xlu1 %v4190_v0, %s3746_s24 }
0x11be   : > { %v1588_v58 = vpop.f32.mrb[48].mxu0 }
0x11bf   : > { %v1594_v59 = vadd.f32 %v1588_v58, %v4202_v6  ;;  %v3274_v60 = vpop.f32.mrb[49].mxu0 }
0x11c0   : > { %v1591_v61 = vpop.f32.mrb[50].mxu0 }
0x11c1   : > { %v1595_v11 = vadd.f32 %v4129_v48, %v1594_v59  ;;  %v3275_v13 = vpop.f32.mrb[51].mxu0 }
0x11c3   : > { %1596 = vst.msk [vmem:[%s4135_s26 + $0x8] sm:$0xff] %vm273_vm0, %v1595_v11 }
0x121f   : > { %v1656_v62 = vpop.xlane.xlu0 %1655 }
0x1220   : > { %3544 = vrcp.f32 %v1656_v62 }
0x1223   : > { %v1661_v63 = vpop.permute.xlu0 %1660 }
0x1224   : > { %v1666_v1 = vsel %vm398_vm3, %v1661_v63, 0 }
0x1225   : > { %3283 = vmatpush3.bf16.msra.mxu0 %v1666_v1 }
0x1226   : > { %3294 = vmatprep.subr.bf16.mxu0 %v3738_v8 }
0x1227   : > { %v1768_v2 = vpop.xlane.xlu1 %1767  ;;  %v1908_v27 = vpop.permute.xlu0 %1907 }
0x1228   : > { %3546 = vrcp.f32 %v1768_v2 }
0x122a   : > { %v3545_v3 = vpop.eup %3544 }
0x122b   : > { %v1658_v4 = vmul.f32 %v3545_v3, %v3541_v51  ;;  %v1773_v5 = vpop.permute.xlu1 %1772 }
0x122c   : > { %v1778_v6 = vsel %vm398_vm3, %v1773_v5, 0 }
0x122d   : > { %v1659_v9 = vpack.c.bf16 %v1658_v4, %v1658_v4 }
0x122f   : > { %3285 = vmatmul.mubr.msk.bf16.vlgmr.msra.gmra.mrb[52].mxu0 %vm333_vm2, %v1659_v9  ;;  %v1910_v20 = vpop.permute.xlu1 %1909 }
0x1230   : > { %3295 = vmatpush3.bf16.msra.mxu0 %v1778_v6  ;;  %3296 = vmatprep.mubr.msk.bf16.mxu0 %vm3739_vm1, %v3738_v8  ;;  %v1915_v25 = vsel %vm333_vm2, %v1910_v20, 0 }
0x1231   : > { %3306 = vmatprep.subr.bf16.mxu0 %v3738_v8 }
0x1232   : > { %v3547_v7 = vpop.eup %3546 }
0x1233   : > { %v1770_v10 = vmul.f32 %v3547_v7, %v3543_v55  ;;  %v4296_v7 = vpack.c.bf16 %v3977_v12, %v3977_v12 }
0x1235   : > { %v1771_v14 = vpack.c.bf16 %v1770_v10, %v1770_v10 }
0x1237   : > { %3297 = vmatmul.mubr.msk.bf16.vlgmr.msra.gmra.mrb[56].mxu0 %vm333_vm2, %v1771_v14 }
0x1238   : > { %3307 = vmatpush3.bf16.msra.mxu0 %v4021_v54  ;;  %3308 = vmatprep.mubr.msk.bf16.mxu0 %vm3739_vm1, %v3738_v8 }
0x1239   : > { %3318 = vmatprep.subr.bf16.mxu0 %v3738_v8 }
0x1302   : > { %v1702_v15 = vpop.f32.mrb[52].mxu0 }
0x1303   : > { %v1708_v16 = vpack.c.bf16 %v1702_v15, %v1702_v15  ;;  %v3286_v18 = vpop.f32.mrb[53].mxu0 }
0x1304   : > { %v1705_v19 = vpop.f32.mrb[54].mxu0 }
0x1305   : > { %v3287_v53 = vpop.f32.mrb[55].mxu0  ;;  %3309 = vmatmul.mubr.msk.bf16.vlgmr.msra.gmra.mrb[60].mxu0 %vm333_vm2, %v1708_v16 }
0x1306   : > { %3320 = vmatprep.mubr.msk.bf16.mxu0 %vm3739_vm1, %v3738_v8 }
0x130a   : > { %v1814_v21 = vpop.f32.mrb[56].mxu0 }
0x130b   : > { %v1820_v22 = vpack.c.bf16 %v1814_v21, %v1814_v21  ;;  %v3298_v23 = vpop.f32.mrb[57].mxu0 }
0x130c   : > { %v1817_v24 = vpop.f32.mrb[58].mxu0 }
0x130d   : > { %v3299_v26 = vpop.f32.mrb[59].mxu0  ;;  %3303 = vmatmul.mubr.msk.bf16.vlgmr.msra.gmra.mrb[56].mxu1 %vm333_vm2, %v1820_v22 }
0x130e   : > { %3313 = vmatpush3.bf16.xpose.msra.mxu1 %v1915_v25  ;;  %3314 = vmatprep.mubr.msk.bf16.mxu1 %vm3739_vm1, %v3738_v8 }
0x130f   : > { %3324 = vmatprep.subr.bf16.mxu1 %v3738_v8 }
0x1315   : > { %3315 = vmatmul.mubr.msk.bf16.vlgmr.msra.gmra.mrb[60].mxu1 %vm333_vm2, %v1908_v27 }
0x1316   : > { %3325 = vmatpush3.bf16.msra.mxu1 %v4062_v41  ;;  %3326 = vmatprep.mubr.msk.bf16.mxu1 %vm3739_vm1, %v3738_v8 }
0x1317   : > { %3336 = vmatprep.subr.bf16.mxu1 %v3738_v8 }
0x13d8   : > { %v1901_v28 = vpop.f32.mrb[60].mxu0 }
0x13d9   : > { %v3310_v29 = vpop.f32.mrb[61].mxu0 }
0x13da   : > { %v1904_v30 = vpop.f32.mrb[62].mxu0 }
0x13db   : > { %v3311_v31 = vpop.f32.mrb[63].mxu0 }
0x13e0   : > { %v1858_v32 = vpop.f32.mrb[56].mxu1 }
0x13e1   : > { %v4266_v33 = vadd.f32 %v1901_v28, %v1858_v32  ;;  %v3304_v34 = vpop.f32.mrb[57].mxu1 }
0x13e2   : > { %v1861_v35 = vpop.f32.mrb[58].mxu1 }
0x13e3   : > { %v3305_v36 = vpop.f32.mrb[59].mxu1 }
0x13e8   : > { %v1951_v37 = vpop.f32.mrb[60].mxu1 }
0x13e9   : > { %v1957_v38 = vmul.f32 0.35355338, %v1951_v37  ;;  %v3316_v39 = vpop.f32.mrb[61].mxu1 }
0x13ea   : > { %v1954_v40 = vpop.f32.mrb[62].mxu1 }
0x13eb   : > { %v3317_v42 = vpop.f32.mrb[63].mxu1  ;;  %v1958_v43 = vsel %vm333_vm2, %v1957_v38, -inf }
0x13ec   : > { %1959 = vmax.xlane.f32.xlu1 %v1958_v43 }
0x13fd   : > { %2065 = vrot.lane.b32.xlu1 %v4190_v0, %s3747_s20 }
0x1401   : > { %2063 = vrot.lane.b32.xlu1 %v4190_v0, %s3748_s28 }
0x1479   : > { %v1960_v44 = vpop.xlane.xlu1 %1959 }
0x147a   : > { %v1961_v45 = vsub.f32 %v1957_v38, %v1960_v44 }
0x147c   : > { %v1962_v46 = vmul.f32 1.442695, %v1961_v45 }
0x147d   : > { %v2066_v58 = vpop.permute.xlu1 %2065 }
0x147e   : > { %3548 = vpow2.f32 %v1962_v46  ;;  %v2071_v60 = vsel %vm333_vm2, %v2066_v58, 0 }
0x1481   : > { %v2064_v61 = vpop.permute.xlu1 %2063 }
0x1488   : > { %v3549_v47 = vpop.eup %3548 }
0x1489   : > { %v1964_v49 = vsel %vm333_vm2, %v3549_v47, 0.0 }
0x148a   : > { %1965 = vadd.xlane.f32.xlu0 %v1964_v49 }
0x14a0   : > { %1970 = vrot.lane.b32.xlu0 %v4190_v0, %s3749_s11 }
0x1517   : > { %v1966_v50 = vpop.xlane.xlu0 %1965 }
0x1518   : > { %3550 = vrcp.f32 %v1966_v50 }
0x151b   : > { %v1971_v51 = vpop.permute.xlu0 %1970 }
0x151c   : > { %v1976_v52 = vsel %vm398_vm3, %v1971_v51, 0 }
0x151d   : > { %3319 = vmatpush3.bf16.msra.mxu0 %v1976_v52 }
0x151e   : > { %3330 = vmatprep.subr.bf16.mxu0 %v3738_v8 }
0x1522   : > { %v3551_v55 = vpop.eup %3550 }
0x1523   : > { %v1968_v57 = vmul.f32 %v3551_v55, %v3549_v47 }
0x1525   : > { %v1969_v59 = vpack.c.bf16 %v1968_v57, %v1968_v57 }
0x1527   : > { %3321 = vmatmul.mubr.msk.bf16.vlgmr.msra.gmra.mrb[64].mxu0 %vm333_vm2, %v1969_v59 }
0x1528   : > { %3331 = vmatpush3.bf16.xpose.msra.mxu0 %v2071_v60  ;;  %3332 = vmatprep.mubr.msk.bf16.mxu0 %vm3739_vm1, %v3738_v8 }
0x1529   : > { %3342 = vmatprep.subr.bf16.mxu0 %v3738_v8 }
0x152f   : > { %3333 = vmatmul.mubr.msk.bf16.vlgmr.msra.gmra.mrb[68].mxu0 %vm333_vm2, %v2064_v61 }
0x1530   : > { %3343 = vmatpush3.bf16.msra.mxu0 %v4105_v17  ;;  %3344 = vmatprep.mubr.msk.bf16.mxu0 %vm3739_vm1, %v3738_v8 }
0x1531   : > { %3354 = vmatprep.subr.bf16.mxu0 %v3738_v8 }
0x15fa   : > { %v2012_v11 = vpop.f32.mrb[64].mxu0 }
0x15fb   : > { %v2018_v13 = vpack.c.bf16 %v2012_v11, %v2012_v11  ;;  %v3322_v62 = vpop.f32.mrb[65].mxu0 }
0x15fc   : > { %v2015_v63 = vpop.f32.mrb[66].mxu0 }
0x15fd   : > { %v3323_v1 = vpop.f32.mrb[67].mxu0  ;;  %3327 = vmatmul.mubr.msk.bf16.vlgmr.msra.gmra.mrb[64].mxu1 %vm333_vm2, %v2018_v13 }
0x15fe   : > { %3338 = vmatprep.mubr.msk.bf16.mxu1 %vm3739_vm1, %v3738_v8 }
0x1602   : > { %v2107_v2 = vpop.f32.mrb[68].mxu0 }
0x1603   : > { %v2113_v3 = vmul.f32 0.35355338, %v2107_v2  ;;  %v3334_v4 = vpop.f32.mrb[69].mxu0 }
0x1604   : > { %v2110_v5 = vpop.f32.mrb[70].mxu0 }
0x1605   : > { %v3335_v9 = vpop.f32.mrb[71].mxu0  ;;  %v2114_v6 = vsel %vm333_vm2, %v2113_v3, -inf }
0x1606   : > { %2115 = vmax.xlane.f32.xlu0 %v2114_v6 }
0x161c   : > { %2126 = vrot.lane.b32.xlu0 %v4190_v0, %s3750_s12 }
0x1620   : > { %2335 = vrot.lane.b32.xlu0 %v4296_v7, %s3742_s27  ;;  %s4409_s27 = scalar_lea.hbm %s4462_s4, %s3023_s10 }
0x1693   : > { %v2116_v10 = vpop.xlane.xlu0 %2115 }
0x1694   : > { %v2117_v14 = vsub.f32 %v2113_v3, %v2116_v10 }
0x1696   : > { %v2118_v15 = vmul.f32 1.442695, %v2117_v14 }
0x1697   : > { %v2127_v16 = vpop.permute.xlu0 %2126 }
0x1698   : > { %3552 = vpow2.f32 %v2118_v15  ;;  %v2132_v18 = vsel %vm398_vm3, %v2127_v16, 0 }
0x1699   : > { %3337 = vmatpush3.bf16.msra.mxu1 %v2132_v18 }
0x169a   : > { %3348 = vmatprep.subr.bf16.mxu1 %v3738_v8 }
0x169b   : > { %v2336_v29 = vpop.permute.xlu0 %2335 }
0x169c   : > { %v2341_v30 = vsel %vm333_vm2, %v2336_v29, 0 }
0x16a2   : > { %v3553_v19 = vpop.eup %3552 }
0x16a3   : > { %v2120_v0 = vsel %vm333_vm2, %v3553_v19, 0.0 }
0x16a4   : > { %2121 = vadd.xlane.f32.xlu1 %v2120_v0 }
0x16b5   : > { %2223 = vrot.lane.b32.xlu1 %v4296_v7, %s3741_s23 }
0x16b9   : > { %2333 = vrot.lane.b32.xlu1 %v4296_v7, %s3740_s21 }
0x16d0   : > { %v2056_v12 = vpop.f32.mrb[64].mxu1 }
0x16d1   : > { %v4308_v53 = vadd.f32 %v2056_v12, %v4266_v33  ;;  %v3328_v20 = vpop.f32.mrb[65].mxu1 }
0x16d2   : > { %v2059_v21 = vpop.f32.mrb[66].mxu1 }
0x16d3   : > { %v3329_v22 = vpop.f32.mrb[67].mxu1 }
0x1731   : > { %v2122_v23 = vpop.xlane.xlu1 %2121 }
0x1732   : > { %3554 = vrcp.f32 %v2122_v23 }
0x1735   : > { %v2224_v26 = vpop.permute.xlu1 %2223 }
0x1736   : > { %v2229_v28 = vsel %vm333_vm2, %v2224_v26, 0 }
0x1739   : > { %v2334_v31 = vpop.permute.xlu1 %2333 }
0x173c   : > { %v3555_v24 = vpop.eup %3554 }
0x173d   : > { %v2124_v25 = vmul.f32 %v3555_v24, %v3553_v19 }
0x173f   : > { %v2125_v27 = vpack.c.bf16 %v2124_v25, %v2124_v25 }
0x1741   : > { %3339 = vmatmul.mubr.msk.bf16.vlgmr.msra.gmra.mrb[68].mxu1 %vm333_vm2, %v2125_v27 }
0x1742   : > { %3349 = vmatpush3.bf16.xpose.msra.mxu1 %v2229_v28  ;;  %3350 = vmatprep.mubr.msk.bf16.mxu1 %vm3739_vm1, %v3738_v8 }
0x1743   : > { %3360 = vmatprep.subr.bf16.mxu1 %v3738_v8 }
0x1749   : > { %3351 = vmatmul.mubr.msk.bf16.vlgmr.msra.gmra.mrb[72].mxu1 %vm333_vm2, %v4296_v7 }
0x174a   : > { %3361 = vmatpush3.bf16.xpose.msra.mxu1 %v2341_v30  ;;  %3362 = vmatprep.mubr.msk.bf16.mxu1 %vm3739_vm1, %v3738_v8 }
0x174b   : > { %3372 = vmatprep.subr.bf16.mxu1 %v3738_v8 }
0x1751   : > { %3363 = vmatmul.mubr.msk.bf16.vlgmr.msra.gmra.mrb[76].mxu1 %vm333_vm2, %v2334_v31 }
0x1752   : > { %3373 = vmatpush3.bf16.msra.mxu1 %v4025_v56  ;;  %3374 = vmatprep.mubr.msk.bf16.mxu1 %vm3739_vm1, %v3738_v8 }
0x1753   : > { %3384 = vmatprep.subr.bf16.mxu1 %v3738_v8 }
0x1814   : > { %v2168_v32 = vpop.f32.mrb[68].mxu1 }
0x1815   : > { %v2174_v33 = vpack.c.bf16 %v2168_v32, %v2168_v32  ;;  %v3340_v34 = vpop.f32.mrb[69].mxu1 }
0x1816   : > { %v2171_v35 = vpop.f32.mrb[70].mxu1 }
0x1817   : > { %v3341_v36 = vpop.f32.mrb[71].mxu1  ;;  %3345 = vmatmul.mubr.msk.bf16.vlgmr.msra.gmra.mrb[72].mxu0 %vm333_vm2, %v2174_v33 }
0x1818   : > { %3356 = vmatprep.mubr.msk.bf16.mxu0 %vm3739_vm1, %v3738_v8 }
0x181c   : > { %v2265_v37 = vpop.f32.mrb[72].mxu1 }
0x181d   : > { %v2271_v38 = vmul.f32 0.35355338, %v2265_v37  ;;  %v3352_v39 = vpop.f32.mrb[73].mxu1 }
0x181e   : > { %v2268_v40 = vpop.f32.mrb[74].mxu1 }
0x181f   : > { %v3353_v56 = vpop.f32.mrb[75].mxu1  ;;  %v2272_v42 = vsel %vm333_vm2, %v2271_v38, -inf }
0x1820   : > { %2273 = vmax.xlane.f32.xlu0 %v2272_v42 }
0x1824   : > { %v2377_v43 = vpop.f32.mrb[76].mxu1 }
0x1825   : > { %v2383_v44 = vmul.f32 0.35355338, %v2377_v43  ;;  %v3364_v45 = vpop.f32.mrb[77].mxu1 }
0x1826   : > { %v2380_v46 = vpop.f32.mrb[78].mxu1 }
0x1827   : > { %v3365_v47 = vpop.f32.mrb[79].mxu1  ;;  %v2384_v49 = vsel %vm333_vm2, %v2383_v44, -inf }
0x1828   : > { %2385 = vmax.xlane.f32.xlu1 %v2384_v49 }
0x1839   : > { %2284 = vrot.lane.b32.xlu1 %v4296_v7, %s3743_s30 }
0x183d   : > { %2533 = vrot.lane.b32.xlu1 %v4296_v7, %s3746_s24  ;;  %s3751_s24 = smov [#allocation8]  }
0x1841   : > { %2531 = vrot.lane.b32.xlu1 %v4296_v7, %s3745_s6  ;;  %s3659_s6 = scalar_lea.vmem %s4404_s8, 512 }
0x1842   : > { %p3660_p11 = scmp.ne.s32.totalorder %s4404_s8, %s3659_s6 }
0x1844   : > { %p3661_p1 = pnand %p3660_p11, %p4476_p0 }
0x1846   : > { %p3662_p3 = pneg %p3661_p1 }
0x18ad   : > { %v2274_v50 = vpop.xlane.xlu0 %2273 }
0x18ae   : > { %v2275_v51 = vsub.f32 %v2271_v38, %v2274_v50 }
0x18b0   : > { %v2276_v52 = vmul.f32 1.442695, %v2275_v51 }
0x18b2   : > { %3556 = vpow2.f32 %v2276_v52 }
0x18b5   : > { %v2386_v55 = vpop.xlane.xlu1 %2385 }
0x18b6   : > { %v2387_v57 = vsub.f32 %v2383_v44, %v2386_v55 }
0x18b8   : > { %v2388_v58 = vmul.f32 1.442695, %v2387_v57 }
0x18b9   : > { %v2285_v59 = vpop.permute.xlu1 %2284 }
0x18ba   : > { %3558 = vpow2.f32 %v2388_v58  ;;  %v2290_v60 = vsel %vm398_vm3, %v2285_v59, 0 }
0x18bb   : > { %3355 = vmatpush3.bf16.msra.mxu0 %v2290_v60 }
0x18bc   : > { %v3557_v61 = vpop.eup %3556  ;;  %3366 = vmatprep.subr.bf16.mxu0 %v3738_v8 }
0x18bd   : > { %v2278_v11 = vsel %vm333_vm2, %v3557_v61, 0.0  ;;  %v2534_v23 = vpop.permute.xlu1 %2533 }
0x18be   : > { %2279 = vadd.xlane.f32.xlu0 %v2278_v11  ;;  %v2539_v27 = vsel %vm333_vm2, %v2534_v23, 0 }
0x18c1   : > { %v2532_v29 = vpop.permute.xlu1 %2531 }
0x18c4   : > { %v3559_v13 = vpop.eup %3558 }
0x18c5   : > { %v2390_v62 = vsel %vm333_vm2, %v3559_v13, 0.0 }
0x18c6   : > { %2391 = vadd.xlane.f32.xlu0 %v2390_v62 }
0x18dc   : > { %2396 = vrot.lane.b32.xlu0 %v4296_v7, %s3744_s5 }
0x18ea   : > { %v2212_v63 = vpop.f32.mrb[72].mxu0 }
0x18eb   : > { %v2218_v1 = vadd.f32 %v2212_v63, %v4308_v53  ;;  %v3346_v2 = vpop.f32.mrb[73].mxu0 }
0x18ec   : > { %v2215_v3 = vpop.f32.mrb[74].mxu0 }
0x18ed   : > { %v2219_v4 = vadd.f32 %v4129_v48, %v2218_v1  ;;  %v3347_v5 = vpop.f32.mrb[75].mxu0 }
0x18ef   : > { %2220 = vst.msk [vmem:[%s4135_s26 + $0x10] sm:$0xff] %vm273_vm0, %v2219_v4 }
0x194b   : > { %v2280_v9 = vpop.xlane.xlu0 %2279 }
0x194c   : > { %3560 = vrcp.f32 %v2280_v9 }
0x1953   : > { %v2392_v6 = vpop.xlane.xlu0 %2391 }
0x1954   : > { %3562 = vrcp.f32 %v2392_v6 }
0x1956   : > { %v3561_v10 = vpop.eup %3560 }
0x1957   : > { %v2282_v14 = vmul.f32 %v3561_v10, %v3557_v61  ;;  %v2397_v15 = vpop.permute.xlu0 %2396 }
0x1958   : > { %v2402_v18 = vsel %vm398_vm3, %v2397_v15, 0 }
0x1959   : > { %v2283_v16 = vpack.c.bf16 %v2282_v14, %v2282_v14 }
0x195b   : > { %3357 = vmatmul.mubr.msk.bf16.vlgmr.msra.gmra.mrb[76].mxu0 %vm333_vm2, %v2283_v16 }
0x195c   : > { %3367 = vmatpush3.bf16.msra.mxu0 %v2402_v18  ;;  %3368 = vmatprep.mubr.msk.bf16.mxu0 %vm3739_vm1, %v3738_v8 }
0x195d   : > { %3378 = vmatprep.subr.bf16.mxu0 %v3738_v8 }
0x195e   : > { %v3563_v48 = vpop.eup %3562 }
0x195f   : > { %v2394_v19 = vmul.f32 %v3563_v48, %v3559_v13 }
0x1961   : > { %v2395_v0 = vpack.c.bf16 %v2394_v19, %v2394_v19 }
0x1963   : > { %3369 = vmatmul.mubr.msk.bf16.vlgmr.msra.gmra.mrb[80].mxu0 %vm333_vm2, %v2395_v0 }
0x1964   : > { %3379 = vmatpush3.bf16.msra.mxu0 %v4021_v54  ;;  %3380 = vmatprep.mubr.msk.bf16.mxu0 %vm3739_vm1, %v3738_v8 }
0x1965   : > { %3390 = vmatprep.subr.bf16.mxu0 %v3738_v8 }
0x1a2e   : > { %v2326_v12 = vpop.f32.mrb[76].mxu0 }
0x1a2f   : > { %v2332_v53 = vpack.c.bf16 %v2326_v12, %v2326_v12  ;;  %v3358_v20 = vpop.f32.mrb[77].mxu0 }
0x1a30   : > { %v2329_v21 = vpop.f32.mrb[78].mxu0 }
0x1a31   : > { %v3359_v22 = vpop.f32.mrb[79].mxu0  ;;  %3381 = vmatmul.mubr.msk.bf16.vlgmr.msra.gmra.mrb[84].mxu0 %vm333_vm2, %v2332_v53 }
0x1a32   : > { %3392 = vmatprep.mubr.msk.bf16.mxu0 %vm3739_vm1, %v3738_v8 }
0x1a36   : > { %v2438_v24 = vpop.f32.mrb[80].mxu0 }
0x1a37   : > { %v2444_v25 = vpack.c.bf16 %v2438_v24, %v2438_v24  ;;  %v3370_v26 = vpop.f32.mrb[81].mxu0 }
0x1a38   : > { %v2441_v54 = vpop.f32.mrb[82].mxu0 }
0x1a39   : > { %v3371_v28 = vpop.f32.mrb[83].mxu0  ;;  %3375 = vmatmul.mubr.msk.bf16.vlgmr.msra.gmra.mrb[80].mxu1 %vm333_vm2, %v2444_v25 }
0x1a3a   : > { %3385 = vmatpush3.bf16.xpose.msra.mxu1 %v2539_v27  ;;  %3386 = vmatprep.mubr.msk.bf16.mxu1 %vm3739_vm1, %v3738_v8 }
0x1a3b   : > { %3396 = vmatprep.subr.bf16.mxu1 %v3738_v8 }
0x1a41   : > { %3387 = vmatmul.mubr.msk.bf16.vlgmr.msra.gmra.mrb[84].mxu1 %vm333_vm2, %v2532_v29 }
0x1a42   : > { %3397 = vmatpush3.bf16.msra.mxu1 %v4062_v41  ;;  %3398 = vmatprep.mubr.msk.bf16.mxu1 %vm3739_vm1, %v3738_v8 }
0x1a43   : > { %3408 = vmatprep.subr.bf16.mxu1 %v3738_v8 }
0x1b04   : > { %v2525_v30 = vpop.f32.mrb[84].mxu0 }
0x1b05   : > { %v3382_v31 = vpop.f32.mrb[85].mxu0 }
0x1b06   : > { %v2528_v32 = vpop.f32.mrb[86].mxu0  ;;  %v3572_v31 = vld [vmem:[%s4461_s3] ss:$0 sm:$0xff] }
0x1b07   : > { %v3383_v33 = vpop.f32.mrb[87].mxu0 }
0x1b0c   : > { %v2482_v34 = vpop.f32.mrb[80].mxu1 }
0x1b0d   : > { %v4370_v35 = vadd.f32 %v2525_v30, %v2482_v34  ;;  %v3376_v36 = vpop.f32.mrb[81].mxu1 }
0x1b0e   : > { %v2485_v37 = vpop.f32.mrb[82].mxu1 }
0x1b0f   : > { %v3377_v38 = vpop.f32.mrb[83].mxu1 }
0x1b14   : > { %v2575_v39 = vpop.f32.mrb[84].mxu1 }
0x1b15   : > { %v2581_v40 = vmul.f32 0.35355338, %v2575_v39  ;;  %v3388_v56 = vpop.f32.mrb[85].mxu1 }
0x1b16   : > { %v2578_v42 = vpop.f32.mrb[86].mxu1 }
0x1b17   : > { %v3389_v41 = vpop.f32.mrb[87].mxu1  ;;  %v2582_v43 = vsel %vm333_vm2, %v2581_v40, -inf }
0x1b18   : > { %2583 = vmax.xlane.f32.xlu0 %v2582_v43 }
0x1b2e   : > { %2594 = vrot.lane.b32.xlu0 %v4296_v7, %s3749_s11 }
0x1b32   : > { %2687 = vrot.lane.b32.xlu0 %v4296_v7, %s3748_s28 }
0x1ba5   : > { %v2584_v44 = vpop.xlane.xlu0 %2583 }
0x1ba6   : > { %v2585_v45 = vsub.f32 %v2581_v40, %v2584_v44 }
0x1ba8   : > { %v2586_v46 = vmul.f32 1.442695, %v2585_v45 }
0x1ba9   : > { %v2595_v47 = vpop.permute.xlu0 %2594 }
0x1baa   : > { %3564 = vpow2.f32 %v2586_v46  ;;  %v2600_v49 = vsel %vm398_vm3, %v2595_v47, 0 }
0x1bab   : > { %3391 = vmatpush3.bf16.msra.mxu0 %v2600_v49 }
0x1bac   : > { %3402 = vmatprep.subr.bf16.mxu0 %v3738_v8 }
0x1bad   : > { %v2688_v61 = vpop.permute.xlu0 %2687 }
0x1bb4   : > { %v3565_v50 = vpop.eup %3564 }
0x1bb5   : > { %v2588_v51 = vsel %vm333_vm2, %v3565_v50, 0.0 }
0x1bb6   : > { %2589 = vadd.xlane.f32.xlu1 %v2588_v51 }
0x1bc7   : > { %2689 = vrot.lane.b32.xlu1 %v4296_v7, %s3747_s20  ;;  %s3663_s20 = sshll.u32 %s3751_s24, 4  ;;  %s3664_s20 = int_to_ptr.vmem [resolvable:$false] %s3663_s20 }
0x1bc8   : > { %s3665_s28 = scalar_lea.vmem %s3664_s20, 1024  ;;  %p3666_p7 = scmp.lt.s32.totalorder %s4404_s8, %s3664_s20 }
0x1bc9   : > { %p3667_p9 = scmp.lt.s32.totalorder %s3665_s28, %s3659_s6 }
0x1bcb   : > { %p3668_p12 = por %p3667_p9, %p3666_p7 }
0x1bcd   : > { %p3669_p2 = pnand %p3668_p12, %p3662_p3 }
0x1c43   : > { %v2590_v52 = vpop.xlane.xlu1 %2589 }
0x1c44   : > { %3566 = vrcp.f32 %v2590_v52 }
0x1c47   : > { %v2690_v58 = vpop.permute.xlu1 %2689 }
0x1c48   : > { %v2695_v60 = vsel %vm333_vm2, %v2690_v58, 0 }
0x1c4e   : > { %v3567_v55 = vpop.eup %3566 }
0x1c4f   : > { %v2592_v57 = vmul.f32 %v3567_v55, %v3565_v50 }
0x1c51   : > { %v2593_v59 = vpack.c.bf16 %v2592_v57, %v2592_v57 }
0x1c53   : > { %3393 = vmatmul.mubr.msk.bf16.vlgmr.msra.gmra.mrb[88].mxu0 %vm333_vm2, %v2593_v59 }
0x1c54   : > { %3403 = vmatpush3.bf16.xpose.msra.mxu0 %v2695_v60  ;;  %3404 = vmatprep.mubr.msk.bf16.mxu0 %vm3739_vm1, %v3738_v8 }
0x1c55   : > { %3414 = vmatprep.subr.bf16.mxu0 %v3738_v8 }
0x1c5b   : > { %3405 = vmatmul.mubr.msk.bf16.vlgmr.msra.gmra.mrb[92].mxu0 %vm333_vm2, %v2688_v61 }
0x1c5c   : > { %3415 = vmatpush3.bf16.msra.mxu0 %v4105_v17  ;;  %3416 = vmatprep.mubr.msk.bf16.mxu0 %vm3739_vm1, %v3738_v8 }
0x1d26   : > { %v2636_v11 = vpop.f32.mrb[88].mxu0 }
0x1d27   : > { %v2642_v13 = vpack.c.bf16 %v2636_v11, %v2636_v11  ;;  %v3394_v62 = vpop.f32.mrb[89].mxu0 }
0x1d28   : > { %v2639_v63 = vpop.f32.mrb[90].mxu0 }
0x1d29   : > { %v3395_v1 = vpop.f32.mrb[91].mxu0  ;;  %3399 = vmatmul.mubr.msk.bf16.vlgmr.msra.gmra.mrb[88].mxu1 %vm333_vm2, %v2642_v13 }
0x1d2a   : > { %3410 = vmatprep.mubr.msk.bf16.mxu1 %vm3739_vm1, %v3738_v8 }
0x1d2e   : > { %v2731_v2 = vpop.f32.mrb[92].mxu0 }
0x1d2f   : > { %v2737_v3 = vmul.f32 0.35355338, %v2731_v2  ;;  %v3406_v4 = vpop.f32.mrb[93].mxu0 }
0x1d30   : > { %v2734_v5 = vpop.f32.mrb[94].mxu0 }
0x1d31   : > { %v3407_v9 = vpop.f32.mrb[95].mxu0  ;;  %v2738_v17 = vsel %vm333_vm2, %v2737_v3, -inf }
0x1d32   : > { %2739 = vmax.xlane.f32.xlu1 %v2738_v17 }
0x1dbf   : > { %v2740_v6 = vpop.xlane.xlu1 %2739 }
0x1dc0   : > { %v2741_v10 = vsub.f32 %v2737_v3, %v2740_v6 }
0x1dc2   : > { %v2742_v14 = vmul.f32 1.442695, %v2741_v10 }
0x1dc4   : > { %3568 = vpow2.f32 %v2742_v14 }
0x1dce   : > { %v3569_v15 = vpop.eup %3568 }
0x1dcf   : > { %v2744_v16 = vsel %vm333_vm2, %v3569_v15, 0.0 }
0x1dd0   : > { %2745 = vadd.xlane.f32.xlu0 %v2744_v16 }
0x1de6   : > { %2750 = vrot.lane.b32.xlu0 %v4296_v7, %s3750_s12 }
0x1dfc   : > { %v2680_v8 = vpop.f32.mrb[88].mxu1 }
0x1dfd   : > { %v2686_v18 = vadd.f32 %v2680_v8, %v4370_v35  ;;  %v3400_v48 = vpop.f32.mrb[89].mxu1 }
0x1dfe   : > { %v2683_v19 = vpop.f32.mrb[90].mxu1 }
0x1dff   : > { %v3401_v0 = vpop.f32.mrb[91].mxu1 }
0x1e5d   : > { %v2746_v12 = vpop.xlane.xlu0 %2745 }
0x1e5e   : > { %3570 = vrcp.f32 %v2746_v12 }
0x1e61   : > { %v2751_v53 = vpop.permute.xlu0 %2750 }
0x1e62   : > { %v2756_v20 = vsel %vm398_vm3, %v2751_v53, 0 }
0x1e63   : > { %3409 = vmatpush3.bf16.msra.mxu1 %v2756_v20 }
0x1e68   : > { %v3571_v21 = vpop.eup %3570 }
0x1e69   : > { %v2748_v22 = vmul.f32 %v3571_v21, %v3569_v15 }
0x1e6b   : > { %v2749_v23 = vpack.c.bf16 %v2748_v22, %v2748_v22 }
0x1e6d   : > { %3411 = vmatmul.mubr.msk.bf16.vlgmr.msra.gmra.mrb[92].mxu1 %vm333_vm2, %v2749_v23 }
0x1f40   : > { %v2792_v7 = vpop.f32.mrb[92].mxu1 }
0x1f41   : > { %v2798_v24 = vpack.c.bf16 %v2792_v7, %v2792_v7  ;;  %v3412_v25 = vpop.f32.mrb[93].mxu1 }
0x1f42   : > { %v2795_v26 = vpop.f32.mrb[94].mxu1 }
0x1f43   : > { %v3413_v54 = vpop.f32.mrb[95].mxu1  ;;  %3417 = vmatmul.mubr.msk.bf16.vlgmr.msra.gmra.mrb[96].mxu0 %vm333_vm2, %v2798_v24 }
0x2016   : > { %v2836_v27 = vpop.f32.mrb[96].mxu0 }
0x2017   : > { %v2842_v28 = vadd.f32 %v2836_v27, %v2686_v18  ;;  %v3418_v29 = vpop.f32.mrb[97].mxu0 }
0x2018   : > { %v2839_v30 = vpop.f32.mrb[98].mxu0 }
0x2019   : > { %v2843_v32 = vadd.f32 %v3572_v31, %v2842_v28  ;;  %v3419_v33 = vpop.f32.mrb[99].mxu0 }
0x201b   : > { %2844 = vst.msk [vmem:[%s4135_s26 + $0x18] sm:$0xff] %vm273_vm0, %v2843_v32 }
0x201c   : > { %3672 = shalt.err (!%p3669_p2)
}
0x201d   : > { %s3673_s11 = scalar_lea.hbm %s4409_s27, 512  ;;  %s3677_s25 = scalar_lea.hbm %s4462_s4, 1024 }
0x201e   : > { %p3674_p13 = scmp.ne.s32.totalorder %s4409_s27, %s3673_s11  ;;  %p3678_p4 = scmp.lt.u32.totalorder %s4409_s27, %s4462_s4 }
0x201f   : > { %p3679_p5 = scmp.lt.u32.totalorder %s3677_s25, %s3673_s11  ;;  %p3681_p11 = scmp.lt.u32.totalorder %s3673_s11, %s4409_s27 }
0x2020   : > { %p3675_p6 = pnand %p3674_p13, %p4476_p0 }
0x2021   : > { %p3680_p8 = por %p3679_p5, %p3678_p4 }
0x2022   : > { %p3676_p10 = pneg %p3675_p6 }
0x2023   : > { %p3682_p1 = por %p3681_p11, %p3680_p8 }
0x2025   : > { %p3683_p3 = pnand %p3682_p1, %p3676_p10 }
0x2027   : > { %3686 = shalt.err (!%p3683_p3)
}
0x2028   : > { %s3752_s21 = smov 128   ;;  %s3753_s23 = smov 8  }
0x2029   : > { %3430 = dma.vmem_to_hbm [thread:$0]  (%p4476_p0), %s4404_s8, 512, %s4409_s27, %s2846_s19, %s3752_s21, %s3752_s21, %s3753_s23  }
0x202a PF: > { %s2874_s30 = sand.u32 1, %s3717_s15   ;;  %p4477_p7 = scmp.ne.s32.totalorder %s4467_s22, 0 }
0x202b   : > { %p4478_p9 = scmp.ge.s32.totalorder %s3729_s18, 2  ;;  %s2875_s5 = scalar_lea.sflag [#allocation4], %s2874_s30 }
0x202d   : > { %p3444_p12 = pnand %p4478_p9, %p4477_p7 }
0x202f   : > { %3712 = dma.done.wait (!%p3444_p12), %s2875_s5, 512  }
0x2030   : > { %3714 = vsyncadd (!%p3444_p12), %s2875_s5, 4294966784  ;;  %p18_p2 = scmp.ge.s32.totalorder %s3889_s9, 4   ;;  %s4479_s15 = smov %s3721_s16 }
0x2031   : > { %s4480_s16 = smov %s3725_s17  ;;  %s4481_s17 = smov %s3905_s14 }
0x2032   : > { %s4482_s18 = smov %s3889_s9  ;;  %20 = sbr.rel (!%p18_p2) target bundleno = 6 (0x6), region = 89 }
0x2039   :  { %2880 = vsyncpa [#allocation3], 1 }
0x203a   :  { %2882 = vsyncpa [#allocation3 + $0x1], 1 }
0x203b   :  { %2883 = vsyncpa [#allocation6], 1 }
0x203c   :  { %2884 = vsyncpa [#allocation4], 1 }
0x203d   :  { %2886 = vsyncpa [#allocation4 + $0x1], 1 }

</bundles_post_ra>
